<compile_context>
chip_gen: v6e
topology: v6e:2x2x1
jax: 0.10.0
libtpu: 0.0.40
codegen_flags: <defaults>
</compile_context>

<pallas_src>
import functools

import jax
import jax.numpy as jnp
from jax.experimental import pallas as pl
from jax.experimental.pallas import tpu as pltpu

EPS = 1e-5
LANE = 128
MAX_TILE_M = 256


def _round_up(x, m):
    return (x + m - 1) // m * m


def _choose_m_tiling(m):
    """(m_padded, tile_m): row tiles in sublane multiples, capped at 256."""
    if m <= MAX_TILE_M:
        m_pad = _round_up(m, 32)
        return m_pad, m_pad
    m_pad = _round_up(m, MAX_TILE_M)
    return m_pad, MAX_TILE_M


# ------------------------------ Pallas kernels ----------------------------- #
def _matmul_stats_kernel(x_ref, w_ref, y_ref, psum_ref, psumsq_ref):
    """bf16 MXU matmul (f32 accumulate) + per-tile BN partial statistics.

    x_ref:      (1, TM, K)   bf16 im2col tile
    w_ref:      (1, K, C)    bf16 weights (resident across the M sweep)
    y_ref:      (1, TM, C)   f32 pre-BN output tile
    psum_ref:   (1, 1, 1, C) f32 per-tile per-channel sum
    psumsq_ref: (1, 1, 1, C) f32 per-tile per-channel sum of squares
    """
    acc = jnp.dot(x_ref[0], w_ref[0], preferred_element_type=jnp.float32)
    y_ref[0] = acc
    psum_ref[...] = jnp.sum(acc, axis=0, keepdims=True)[None, None]
    psumsq_ref[...] = jnp.sum(acc * acc, axis=0, keepdims=True)[None, None]


def _matmul_act_kernel(x_ref, w_ref, y_ref, *, activation):
    """bf16 MXU matmul (f32 accumulate) + fused activation (no BN path)."""
    acc = jnp.dot(x_ref[0], w_ref[0], preferred_element_type=jnp.float32)
    if activation == "tanh":
        acc = jnp.tanh(acc)
    elif activation == "relu":
        acc = jnp.maximum(acc, 0.0)
    y_ref[0] = acc


def _scale_shift_relu_kernel(y_ref, scale_ref, shift_ref, o_ref):
    """Per-channel affine (folded BatchNorm) + ReLU, all in f32."""
    o_ref[0] = jnp.maximum(y_ref[0] * scale_ref[...] + shift_ref[...], 0.0)


# ------------------------------ kernel wrappers ---------------------------- #
def _phase_matmul(x_col, w_col, tile_m, *, compute_stats, activation="none"):
    p, m_pad, k_pad = x_col.shape
    _, _, c_pad = w_col.shape
    mt = m_pad // tile_m

    x_spec = pl.BlockSpec((1, tile_m, k_pad), lambda i, j: (i, j, 0))
    w_spec = pl.BlockSpec((1, k_pad, c_pad), lambda i, j: (i, 0, 0))
    y_spec = pl.BlockSpec((1, tile_m, c_pad), lambda i, j: (i, j, 0))
    y_shape = jax.ShapeDtypeStruct((p, m_pad, c_pad), jnp.float32)
    cparams = pltpu.CompilerParams(
        dimension_semantics=("parallel", "parallel"))

    if compute_stats:
        stat_shape = jax.ShapeDtypeStruct((p, mt, 1, c_pad), jnp.float32)
        stat_spec = pl.BlockSpec((1, 1, 1, c_pad), lambda i, j: (i, j, 0, 0))
        return pl.pallas_call(
            _matmul_stats_kernel,
            out_shape=(y_shape, stat_shape, stat_shape),
            grid=(p, mt),
            in_specs=[x_spec, w_spec],
            out_specs=(y_spec, stat_spec, stat_spec),
            compiler_params=cparams,
        )(x_col, w_col)

    kernel = functools.partial(_matmul_act_kernel, activation=activation)
    return pl.pallas_call(
        kernel,
        out_shape=y_shape,
        grid=(p, mt),
        in_specs=[x_spec, w_spec],
        out_specs=y_spec,
        compiler_params=cparams,
    )(x_col, w_col)


def _scale_shift_relu(y, scale, shift, tile_m):
    p, m_pad, c_pad = y.shape
    return pl.pallas_call(
        _scale_shift_relu_kernel,
        out_shape=jax.ShapeDtypeStruct((p, m_pad, c_pad), jnp.float32),
        grid=(p, m_pad // tile_m),
        in_specs=[
            pl.BlockSpec((1, tile_m, c_pad), lambda i, j: (i, j, 0)),
            pl.BlockSpec((1, c_pad), lambda i, j: (0, 0)),
            pl.BlockSpec((1, c_pad), lambda i, j: (0, 0)),
        ],
        out_specs=pl.BlockSpec((1, tile_m, c_pad), lambda i, j: (i, j, 0)),
        compiler_params=pltpu.CompilerParams(
            dimension_semantics=("parallel", "parallel")),
    )(y, scale, shift)


# ------------------------- layer glue (JAX, static) ------------------------ #
def _phase_im2col(x_nhwc, w_ct, stride, pad):
    """Phase-decomposed transposed-conv im2col.

    out[n, st*a + r, st*b + s, co] =
        sum_{dy,dx valid for (r,s), ci} x[n, a+off_y, b+off_x, ci] * W[ci,co,dy,dx]

    Returns x_col (P, M_pad, K_pad) bf16, w_col (P, K_pad, C_pad) bf16 and
    reassembly metadata. P = stride**2; padded rows/cols are zero.
    """
    n, h, w, cin = x_nhwc.shape
    _, cout, kh, kw = w_ct.shape
    ho = (h - 1) * stride - 2 * pad + kh
    wo = (w - 1) * stride - 2 * pad + kw
    assert ho % stride == 0 and wo % stride == 0

    hop, wop = ho // stride, wo // stride

    def taps(r, k):
        ds = [d for d in range(k) if (d - (r + pad)) % stride == 0]
        offs = [(r + pad - d) // stride for d in ds]
        return ds, offs

    phase_y = [taps(r, kh) for r in range(stride)]
    phase_x = [taps(s, kw) for s in range(stride)]
    n_dy = len(phase_y[0][0])
    n_dx = len(phase_x[0][0])
    assert all(len(d) == n_dy for d, _ in phase_y)
    assert all(len(d) == n_dx for d, _ in phase_x)

    offs_all_y = [o for _, offs in phase_y for o in offs]
    offs_all_x = [o for _, offs in phase_x for o in offs]
    p_top = max(0, -min(offs_all_y))
    p_bot = max(0, max(offs_all_y) + hop - h)
    p_lft = max(0, -min(offs_all_x))
    p_rgt = max(0, max(offs_all_x) + wop - w)
    xp = jnp.pad(x_nhwc, ((0, 0), (p_top, p_bot), (p_lft, p_rgt), (0, 0)))

    k_eff = n_dy * n_dx * cin
    m_eff = n * hop * wop
    m_pad, tile_m = _choose_m_tiling(m_eff)
    k_pad = _round_up(k_eff, LANE)
    c_pad = _round_up(cout, LANE)

    x_cols, w_cols = [], []
    for r in range(stride):
        dys, offs_y = phase_y[r]
        for s in range(stride):
            dxs, offs_x = phase_x[s]
            # TODO(synk): the im2col patches are still materialized in HBM
            # (per phase); an in-kernel tap gather (overlapping windows /
            # manual DMA) would further cut HBM traffic at large shapes.
            patches = [
                xp[:, p_top + oy:p_top + oy + hop,
                   p_lft + ox:p_lft + ox + wop, :]
                for oy in offs_y for ox in offs_x
            ]
            xc = jnp.stack(patches, axis=3).reshape(m_eff, k_eff)
            xc = jnp.pad(xc, ((0, m_pad - m_eff), (0, k_pad - k_eff)))
            x_cols.append(xc)

            wsub = w_ct[:, :, dys, :][:, :, :, dxs]        # (Cin,Cout,ndy,ndx)
            wsub = jnp.transpose(wsub, (2, 3, 0, 1)).reshape(k_eff, cout)
            wsub = jnp.pad(wsub, ((0, k_pad - k_eff), (0, c_pad - cout)))
            w_cols.append(wsub)

    x_col = jnp.stack(x_cols, axis=0).astype(jnp.bfloat16)
    w_col = jnp.stack(w_cols, axis=0).astype(jnp.bfloat16)
    meta = dict(n=n, ho=ho, wo=wo, hop=hop, wop=wop, cout=cout, c_pad=c_pad,
                m_eff=m_eff, tile_m=tile_m, stride=stride)
    return x_col, w_col, meta


def _reassemble(y, meta):
    """(P, M_pad, C_pad) -> (N, Ho, Wo, Cout), interleaving the phases."""
    st = meta["stride"]
    n, hop, wop, cout = meta["n"], meta["hop"], meta["wop"], meta["cout"]
    y = y[:, :meta["m_eff"], :cout]
    y = y.reshape(st, st, n, hop, wop, cout)
    y = jnp.transpose(y, (2, 3, 0, 4, 1, 5))   # (n, a, r, b, s, c)
    return y.reshape(n, hop * st, wop * st, cout)


def conv_transpose_block(x_nhwc, w_ct, gamma, beta, stride, pad,
                         use_bn, activation):
    """ConvTranspose2d(bias=False) [+ BatchNorm2d (batch stats) + ReLU | Tanh]."""
    x_col, w_col, meta = _phase_im2col(x_nhwc, w_ct, stride, pad)
    tile_m, c_pad, cout = meta["tile_m"], meta["c_pad"], meta["cout"]

    if use_bn:
        assert activation == "relu"
        y, psum, psumsq = _phase_matmul(x_col, w_col, tile_m,
                                        compute_stats=True)
        # tiny per-channel reduction of the in-kernel partials (f32)
        count = float(meta["n"] * meta["ho"] * meta["wo"])
        s1 = jnp.sum(psum, axis=(0, 1, 2))        # (C_pad,)
        s2 = jnp.sum(psumsq, axis=(0, 1, 2))
        mean = s1 / count
        var = jnp.maximum(s2 / count - mean * mean, 0.0)   # biased, as PyTorch
        inv = jax.lax.rsqrt(var + EPS)
        gamma_p = jnp.pad(gamma.astype(jnp.float32), (0, c_pad - cout),
                          constant_values=1.0)
        beta_p = jnp.pad(beta.astype(jnp.float32), (0, c_pad - cout))
        scale = (gamma_p * inv).reshape(1, c_pad)
        shift = (beta_p - mean * gamma_p * inv).reshape(1, c_pad)
        y = _scale_shift_relu(y, scale, shift, tile_m)
    else:
        y = _phase_matmul(x_col, w_col, tile_m,
                          compute_stats=False, activation=activation)

    return _reassemble(y, meta)


# --------------------------- parameters / model ----------------------------- #
def init_params(key, nz, ngf, nc):
    ks = jax.random.split(key, 11)

    def conv_w(k, cin, cout, kh, kw):
        return 0.02 * jax.random.normal(k, (cin, cout, kh, kw), jnp.float32)

    def bn_params(k, c):
        g = 1.0 + 0.02 * jax.random.normal(k, (c,), jnp.float32)
        b = jnp.zeros((c,), jnp.float32)
        return g, b

    p = {}
    p["w1"] = conv_w(ks[0], nz, ngf * 8, 4, 4)
    p["g1"], p["b1"] = bn_params(ks[1], ngf * 8)
    p["w2"] = conv_w(ks[2], ngf * 8, ngf * 4, 4, 4)
    p["g2"], p["b2"] = bn_params(ks[3], ngf * 4)
    p["w3"] = conv_w(ks[4], ngf * 4, ngf * 2, 4, 4)
    p["g3"], p["b3"] = bn_params(ks[5], ngf * 2)
    p["w4"] = conv_w(ks[6], ngf * 2, ngf * 2, 3, 3)
    p["g4"], p["b4"] = bn_params(ks[7], ngf * 2)
    p["w5"] = conv_w(ks[8], ngf * 2, ngf * 2, 3, 3)
    p["g5"], p["b5"] = bn_params(ks[9], ngf * 2)
    p["w6"] = conv_w(ks[10], ngf * 2, nc, 4, 4)
    return p


def netG_forward(params, noise_nchw):
    x = jnp.transpose(noise_nchw, (0, 2, 3, 1))  # NCHW -> NHWC
    x = conv_transpose_block(x, params["w1"], params["g1"], params["b1"],
                             stride=1, pad=0, use_bn=True, activation="relu")
    x = conv_transpose_block(x, params["w2"], params["g2"], params["b2"],
                             stride=2, pad=1, use_bn=True, activation="relu")
    x = conv_transpose_block(x, params["w3"], params["g3"], params["b3"],
                             stride=2, pad=1, use_bn=True, activation="relu")
    x = conv_transpose_block(x, params["w4"], params["g4"], params["b4"],
                             stride=1, pad=1, use_bn=True, activation="relu")
    x = conv_transpose_block(x, params["w5"], params["g5"], params["b5"],
                             stride=1, pad=1, use_bn=True, activation="relu")
    x = conv_transpose_block(x, params["w6"], None, None,
                             stride=2, pad=1, use_bn=False, activation="tanh")
    return jnp.transpose(x, (0, 3, 1, 2))  # NHWC -> NCHW


if __name__ == "__main__":
    batch, nz, ngf, nc = 2, 8, 4, 3   # small, consistent with the module

    key = jax.random.PRNGKey(0)
    k_params, k_noise = jax.random.split(key)
    params = init_params(k_params, nz, ngf, nc)

    # torch.rand -> uniform [0,1); generator noise input is (N, nz, 1, 1)
    noise = jax.random.uniform(k_noise, (batch, nz, 1, 1), jnp.float32)

    out = jax.jit(netG_forward)(params, noise)
    out = jax.block_until_ready(out)

    expected_shape = (batch, nc, 32, 32)
    assert out.shape == expected_shape, (out.shape, expected_shape)
    assert out.dtype == jnp.float32
    assert bool(jnp.all(jnp.isfinite(out)))
    assert bool(jnp.all(jnp.abs(out) <= 1.0))  # tanh output range

    print("KERNEL_OK")
</pallas_src>

<mosaic_0001>
module attributes {stable_mosaic.version = 11 : i64} {
  func.func @_scale_shift_relu_kernel(%arg0: i32, %arg1: i32, %arg2: memref<1x32x128xf32, #tpu.memory_space<vmem>>, %arg3: memref<1x128xf32, #tpu.memory_space<vmem>>, %arg4: memref<1x128xf32, #tpu.memory_space<vmem>>, %arg5: memref<1x32x128xf32, #tpu.memory_space<vmem>>) attributes {dimension_semantics = [#tpu.dimension_semantics<parallel>, #tpu.dimension_semantics<parallel>], iteration_bounds = array<i64: 1, 1>, scalar_prefetch = 0 : i64, scratch_operands = 0 : i64, tpu.core_type = #tpu.core_type<tc>, window_params = [{transform_indices = @transform_0, window_bounds = array<i64: 1, 32, 128>}, {pipeline_mode = #tpu.pipeline_mode<synchronous>, transform_indices = @transform_1, window_bounds = array<i64: 1, 128>}, {pipeline_mode = #tpu.pipeline_mode<synchronous>, transform_indices = @transform_2, window_bounds = array<i64: 1, 128>}, {transform_indices = @transform_3, window_bounds = array<i64: 1, 32, 128>}]} {
    %c0 = arith.constant 0 : index
    %c0_0 = arith.constant 0 : index
    %c0_1 = arith.constant 0 : index
    %0 = vector.load %arg2[%c0, %c0_0, %c0_1] : memref<1x32x128xf32, #tpu.memory_space<vmem>>, vector<1x32x128xf32>
    %1 = vector.shape_cast %0 : vector<1x32x128xf32> to vector<32x128xf32>
    %c0_2 = arith.constant 0 : index
    %c0_3 = arith.constant 0 : index
    %2 = vector.load %arg3[%c0_2, %c0_3] : memref<1x128xf32, #tpu.memory_space<vmem>>, vector<1x128xf32>
    %3 = vector.broadcast %2 : vector<1x128xf32> to vector<32x128xf32>
    %4 = arith.mulf %1, %3 : vector<32x128xf32>
    %c0_4 = arith.constant 0 : index
    %c0_5 = arith.constant 0 : index
    %5 = vector.load %arg4[%c0_4, %c0_5] : memref<1x128xf32, #tpu.memory_space<vmem>>, vector<1x128xf32>
    %6 = vector.broadcast %5 : vector<1x128xf32> to vector<32x128xf32>
    %7 = arith.addf %4, %6 : vector<32x128xf32>
    %cst = arith.constant 0.000000e+00 : f32
    %8 = vector.broadcast %cst : f32 to vector<32x128xf32>
    %9 = arith.maximumf %7, %8 : vector<32x128xf32>
    %c0_6 = arith.constant 0 : index
    %c0_7 = arith.constant 0 : index
    %c0_8 = arith.constant 0 : index
    %10 = vector.load %arg5[%c0_6, %c0_7, %c0_8] : memref<1x32x128xf32, #tpu.memory_space<vmem>>, vector<1x32x128xf32>
    %11 = vector.shape_cast %10 : vector<1x32x128xf32> to vector<32x128xf32>
    %12 = vector.shape_cast %9 : vector<32x128xf32> to vector<1x32x128xf32>
    tpu.vector_store %arg5[%c0_6, %c0_7, %c0_8], %12 {strides = array<i32>} : memref<1x32x128xf32, #tpu.memory_space<vmem>>, vector<1x32x128xf32>,
    return
  }
  func.func @transform_0(%arg0: i32, %arg1: i32) -> (i32, i32, i32) {
    %c0_i32 = arith.constant 0 : i32
    %c0_i32_0 = arith.constant 0 : i32
    return %arg0, %arg1, %c0_i32 : i32, i32, i32
  }
  func.func @transform_1(%arg0: i32, %arg1: i32) -> (i32, i32) {
    %c0_i32 = arith.constant 0 : i32
    %c0_i32_0 = arith.constant 0 : i32
    %c0_i32_1 = arith.constant 0 : i32
    return %c0_i32, %c0_i32_0 : i32, i32
  }
  func.func @transform_2(%arg0: i32, %arg1: i32) -> (i32, i32) {
    %c0_i32 = arith.constant 0 : i32
    %c0_i32_0 = arith.constant 0 : i32
    %c0_i32_1 = arith.constant 0 : i32
    return %c0_i32, %c0_i32_0 : i32, i32
  }
  func.func @transform_3(%arg0: i32, %arg1: i32) -> (i32, i32, i32) {
    %c0_i32 = arith.constant 0 : i32
    %c0_i32_0 = arith.constant 0 : i32
    return %arg0, %arg1, %c0_i32 : i32, i32, i32
  }
}

module attributes {stable_mosaic.version = 11 : i64} {
  func.func @_matmul_stats_kernel(%arg0: i32, %arg1: i32, %arg2: memref<1x32x128xbf16, #tpu.memory_space<vmem>>, %arg3: memref<1x128x128xbf16, #tpu.memory_space<vmem>>, %arg4: memref<1x32x128xf32, #tpu.memory_space<vmem>>, %arg5: memref<1x1x1x128xf32, #tpu.memory_space<vmem>>, %arg6: memref<1x1x1x128xf32, #tpu.memory_space<vmem>>) attributes {dimension_semantics = [#tpu.dimension_semantics<parallel>, #tpu.dimension_semantics<parallel>], iteration_bounds = array<i64: 1, 1>, scalar_prefetch = 0 : i64, scratch_operands = 0 : i64, tpu.core_type = #tpu.core_type<tc>, window_params = [{transform_indices = @transform_0, window_bounds = array<i64: 1, 32, 128>}, {transform_indices = @transform_1, window_bounds = array<i64: 1, 128, 128>}, {transform_indices = @transform_2, window_bounds = array<i64: 1, 32, 128>}, {transform_indices = @transform_3, window_bounds = array<i64: 1, 1, 1, 128>}, {transform_indices = @transform_4, window_bounds = array<i64: 1, 1, 1, 128>}]} {
    %c0 = arith.constant 0 : index
    %c0_0 = arith.constant 0 : index
    %c0_1 = arith.constant 0 : index
    %0 = vector.load %arg2[%c0, %c0_0, %c0_1] : memref<1x32x128xbf16, #tpu.memory_space<vmem>>, vector<1x32x128xbf16>
    %1 = vector.shape_cast %0 : vector<1x32x128xbf16> to vector<32x128xbf16>
    %c0_2 = arith.constant 0 : index
    %c0_3 = arith.constant 0 : index
    %c0_4 = arith.constant 0 : index
    %2 = vector.load %arg3[%c0_2, %c0_3, %c0_4] : memref<1x128x128xbf16, #tpu.memory_space<vmem>>, vector<1x128x128xbf16>
    %3 = vector.shape_cast %2 : vector<1x128x128xbf16> to vector<128x128xbf16>
    %cst = arith.constant dense<0.000000e+00> : vector<32x128xf32>
    %4 = tpu.matmul %1, %3, %cst {dimension_numbers = #tpu.dot_dimension_numbers<[1], [0], [0], [1], [0, 0, 1, 1], [], []>} : vector<32x128xbf16>, vector<128x128xbf16>, vector<32x128xf32> -> vector<32x128xf32>
    %c0_5 = arith.constant 0 : index
    %c0_6 = arith.constant 0 : index
    %c0_7 = arith.constant 0 : index
    %5 = vector.load %arg4[%c0_5, %c0_6, %c0_7] : memref<1x32x128xf32, #tpu.memory_space<vmem>>, vector<1x32x128xf32>
    %6 = vector.shape_cast %5 : vector<1x32x128xf32> to vector<32x128xf32>
    %7 = vector.shape_cast %4 : vector<32x128xf32> to vector<1x32x128xf32>
    tpu.vector_store %arg4[%c0_5, %c0_6, %c0_7], %7 {strides = array<i32>} : memref<1x32x128xf32, #tpu.memory_space<vmem>>, vector<1x32x128xf32>,
    %cst_8 = arith.constant dense<0.000000e+00> : vector<128xf32>
    %8 = vector.multi_reduction <add>, %4, %cst_8 [0] : vector<32x128xf32> to vector<128xf32>
    %9 = vector.shape_cast %8 : vector<128xf32> to vector<1x128xf32>
    %10 = vector.shape_cast %9 : vector<1x128xf32> to vector<1x1x1x128xf32>
    %c0_9 = arith.constant 0 : index
    %c0_10 = arith.constant 0 : index
    %c0_11 = arith.constant 0 : index
    %c0_12 = arith.constant 0 : index
    %11 = vector.load %arg5[%c0_9, %c0_10, %c0_11, %c0_12] : memref<1x1x1x128xf32, #tpu.memory_space<vmem>>, vector<1x1x1x128xf32>
    tpu.vector_store %arg5[%c0_9, %c0_10, %c0_11, %c0_12], %10 {strides = array<i32>} : memref<1x1x1x128xf32, #tpu.memory_space<vmem>>, vector<1x1x1x128xf32>,
    %12 = arith.mulf %4, %4 : vector<32x128xf32>
    %cst_13 = arith.constant dense<0.000000e+00> : vector<128xf32>
    %13 = vector.multi_reduction <add>, %12, %cst_13 [0] : vector<32x128xf32> to vector<128xf32>
    %14 = vector.shape_cast %13 : vector<128xf32> to vector<1x128xf32>
    %15 = vector.shape_cast %14 : vector<1x128xf32> to vector<1x1x1x128xf32>
    %c0_14 = arith.constant 0 : index
    %c0_15 = arith.constant 0 : index
    %c0_16 = arith.constant 0 : index
    %c0_17 = arith.constant 0 : index
    %16 = vector.load %arg6[%c0_14, %c0_15, %c0_16, %c0_17] : memref<1x1x1x128xf32, #tpu.memory_space<vmem>>, vector<1x1x1x128xf32>
    tpu.vector_store %arg6[%c0_14, %c0_15, %c0_16, %c0_17], %15 {strides = array<i32>} : memref<1x1x1x128xf32, #tpu.memory_space<vmem>>, vector<1x1x1x128xf32>,
    return
  }
  func.func @transform_0(%arg0: i32, %arg1: i32) -> (i32, i32, i32) {
    %c0_i32 = arith.constant 0 : i32
    %c0_i32_0 = arith.constant 0 : i32
    return %arg0, %arg1, %c0_i32 : i32, i32, i32
  }
  func.func @transform_1(%arg0: i32, %arg1: i32) -> (i32, i32, i32) {
    %c0_i32 = arith.constant 0 : i32
    %c0_i32_0 = arith.constant 0 : i32
    %c0_i32_1 = arith.constant 0 : i32
    return %arg0, %c0_i32, %c0_i32_0 : i32, i32, i32
  }
  func.func @transform_2(%arg0: i32, %arg1: i32) -> (i32, i32, i32) {
    %c0_i32 = arith.constant 0 : i32
    %c0_i32_0 = arith.constant 0 : i32
    return %arg0, %arg1, %c0_i32 : i32, i32, i32
  }
  func.func @transform_3(%arg0: i32, %arg1: i32) -> (i32, i32, i32, i32) {
    %c0_i32 = arith.constant 0 : i32
    %c0_i32_0 = arith.constant 0 : i32
    %c0_i32_1 = arith.constant 0 : i32
    return %arg0, %arg1, %c0_i32, %c0_i32_0 : i32, i32, i32, i32
  }
  func.func @transform_4(%arg0: i32, %arg1: i32) -> (i32, i32, i32, i32) {
    %c0_i32 = arith.constant 0 : i32
    %c0_i32_0 = arith.constant 0 : i32
    %c0_i32_1 = arith.constant 0 : i32
    return %arg0, %arg1, %c0_i32, %c0_i32_0 : i32, i32, i32, i32
  }
}

module attributes {stable_mosaic.version = 11 : i64} {
  func.func @_matmul_stats_kernel(%arg0: i32, %arg1: i32, %arg2: memref<1x32x128xbf16, #tpu.memory_space<vmem>>, %arg3: memref<1x128x128xbf16, #tpu.memory_space<vmem>>, %arg4: memref<1x32x128xf32, #tpu.memory_space<vmem>>, %arg5: memref<1x1x1x128xf32, #tpu.memory_space<vmem>>, %arg6: memref<1x1x1x128xf32, #tpu.memory_space<vmem>>) attributes {dimension_semantics = [#tpu.dimension_semantics<parallel>, #tpu.dimension_semantics<parallel>], iteration_bounds = array<i64: 4, 1>, scalar_prefetch = 0 : i64, scratch_operands = 0 : i64, tpu.core_type = #tpu.core_type<tc>, window_params = [{transform_indices = @transform_0, window_bounds = array<i64: 1, 32, 128>}, {transform_indices = @transform_1, window_bounds = array<i64: 1, 128, 128>}, {transform_indices = @transform_2, window_bounds = array<i64: 1, 32, 128>}, {transform_indices = @transform_3, window_bounds = array<i64: 1, 1, 1, 128>}, {transform_indices = @transform_4, window_bounds = array<i64: 1, 1, 1, 128>}]} {
    %c0 = arith.constant 0 : index
    %c0_0 = arith.constant 0 : index
    %c0_1 = arith.constant 0 : index
    %0 = vector.load %arg2[%c0, %c0_0, %c0_1] : memref<1x32x128xbf16, #tpu.memory_space<vmem>>, vector<1x32x128xbf16>
    %1 = vector.shape_cast %0 : vector<1x32x128xbf16> to vector<32x128xbf16>
    %c0_2 = arith.constant 0 : index
    %c0_3 = arith.constant 0 : index
    %c0_4 = arith.constant 0 : index
    %2 = vector.load %arg3[%c0_2, %c0_3, %c0_4] : memref<1x128x128xbf16, #tpu.memory_space<vmem>>, vector<1x128x128xbf16>
    %3 = vector.shape_cast %2 : vector<1x128x128xbf16> to vector<128x128xbf16>
    %cst = arith.constant dense<0.000000e+00> : vector<32x128xf32>
    %4 = tpu.matmul %1, %3, %cst {dimension_numbers = #tpu.dot_dimension_numbers<[1], [0], [0], [1], [0, 0, 1, 1], [], []>} : vector<32x128xbf16>, vector<128x128xbf16>, vector<32x128xf32> -> vector<32x128xf32>
    %c0_5 = arith.constant 0 : index
    %c0_6 = arith.constant 0 : index
    %c0_7 = arith.constant 0 : index
    %5 = vector.load %arg4[%c0_5, %c0_6, %c0_7] : memref<1x32x128xf32, #tpu.memory_space<vmem>>, vector<1x32x128xf32>
    %6 = vector.shape_cast %5 : vector<1x32x128xf32> to vector<32x128xf32>
    %7 = vector.shape_cast %4 : vector<32x128xf32> to vector<1x32x128xf32>
    tpu.vector_store %arg4[%c0_5, %c0_6, %c0_7], %7 {strides = array<i32>} : memref<1x32x128xf32, #tpu.memory_space<vmem>>, vector<1x32x128xf32>,
    %cst_8 = arith.constant dense<0.000000e+00> : vector<128xf32>
    %8 = vector.multi_reduction <add>, %4, %cst_8 [0] : vector<32x128xf32> to vector<128xf32>
    %9 = vector.shape_cast %8 : vector<128xf32> to vector<1x128xf32>
    %10 = vector.shape_cast %9 : vector<1x128xf32> to vector<1x1x1x128xf32>
    %c0_9 = arith.constant 0 : index
    %c0_10 = arith.constant 0 : index
    %c0_11 = arith.constant 0 : index
    %c0_12 = arith.constant 0 : index
    %11 = vector.load %arg5[%c0_9, %c0_10, %c0_11, %c0_12] : memref<1x1x1x128xf32, #tpu.memory_space<vmem>>, vector<1x1x1x128xf32>
    tpu.vector_store %arg5[%c0_9, %c0_10, %c0_11, %c0_12], %10 {strides = array<i32>} : memref<1x1x1x128xf32, #tpu.memory_space<vmem>>, vector<1x1x1x128xf32>,
    %12 = arith.mulf %4, %4 : vector<32x128xf32>
    %cst_13 = arith.constant dense<0.000000e+00> : vector<128xf32>
    %13 = vector.multi_reduction <add>, %12, %cst_13 [0] : vector<32x128xf32> to vector<128xf32>
    %14 = vector.shape_cast %13 : vector<128xf32> to vector<1x128xf32>
    %15 = vector.shape_cast %14 : vector<1x128xf32> to vector<1x1x1x128xf32>
    %c0_14 = arith.constant 0 : index
    %c0_15 = arith.constant 0 : index
    %c0_16 = arith.constant 0 : index
    %c0_17 = arith.constant 0 : index
    %16 = vector.load %arg6[%c0_14, %c0_15, %c0_16, %c0_17] : memref<1x1x1x128xf32, #tpu.memory_space<vmem>>, vector<1x1x1x128xf32>
    tpu.vector_store %arg6[%c0_14, %c0_15, %c0_16, %c0_17], %15 {strides = array<i32>} : memref<1x1x1x128xf32, #tpu.memory_space<vmem>>, vector<1x1x1x128xf32>,
    return
  }
  func.func @transform_0(%arg0: i32, %arg1: i32) -> (i32, i32, i32) {
    %c0_i32 = arith.constant 0 : i32
    %c0_i32_0 = arith.constant 0 : i32
    return %arg0, %arg1, %c0_i32 : i32, i32, i32
  }
  func.func @transform_1(%arg0: i32, %arg1: i32) -> (i32, i32, i32) {
    %c0_i32 = arith.constant 0 : i32
    %c0_i32_0 = arith.constant 0 : i32
    %c0_i32_1 = arith.constant 0 : i32
    return %arg0, %c0_i32, %c0_i32_0 : i32, i32, i32
  }
  func.func @transform_2(%arg0: i32, %arg1: i32) -> (i32, i32, i32) {
    %c0_i32 = arith.constant 0 : i32
    %c0_i32_0 = arith.constant 0 : i32
    return %arg0, %arg1, %c0_i32 : i32, i32, i32
  }
  func.func @transform_3(%arg0: i32, %arg1: i32) -> (i32, i32, i32, i32) {
    %c0_i32 = arith.constant 0 : i32
    %c0_i32_0 = arith.constant 0 : i32
    %c0_i32_1 = arith.constant 0 : i32
    return %arg0, %arg1, %c0_i32, %c0_i32_0 : i32, i32, i32, i32
  }
  func.func @transform_4(%arg0: i32, %arg1: i32) -> (i32, i32, i32, i32) {
    %c0_i32 = arith.constant 0 : i32
    %c0_i32_0 = arith.constant 0 : i32
    %c0_i32_1 = arith.constant 0 : i32
    return %arg0, %arg1, %c0_i32, %c0_i32_0 : i32, i32, i32, i32
  }
}

module attributes {stable_mosaic.version = 11 : i64} {
  func.func @_scale_shift_relu_kernel(%arg0: i32, %arg1: i32, %arg2: memref<1x32x128xf32, #tpu.memory_space<vmem>>, %arg3: memref<1x128xf32, #tpu.memory_space<vmem>>, %arg4: memref<1x128xf32, #tpu.memory_space<vmem>>, %arg5: memref<1x32x128xf32, #tpu.memory_space<vmem>>) attributes {dimension_semantics = [#tpu.dimension_semantics<parallel>, #tpu.dimension_semantics<parallel>], iteration_bounds = array<i64: 4, 1>, scalar_prefetch = 0 : i64, scratch_operands = 0 : i64, tpu.core_type = #tpu.core_type<tc>, window_params = [{transform_indices = @transform_0, window_bounds = array<i64: 1, 32, 128>}, {pipeline_mode = #tpu.pipeline_mode<synchronous>, transform_indices = @transform_1, window_bounds = array<i64: 1, 128>}, {pipeline_mode = #tpu.pipeline_mode<synchronous>, transform_indices = @transform_2, window_bounds = array<i64: 1, 128>}, {transform_indices = @transform_3, window_bounds = array<i64: 1, 32, 128>}]} {
    %c0 = arith.constant 0 : index
    %c0_0 = arith.constant 0 : index
    %c0_1 = arith.constant 0 : index
    %0 = vector.load %arg2[%c0, %c0_0, %c0_1] : memref<1x32x128xf32, #tpu.memory_space<vmem>>, vector<1x32x128xf32>
    %1 = vector.shape_cast %0 : vector<1x32x128xf32> to vector<32x128xf32>
    %c0_2 = arith.constant 0 : index
    %c0_3 = arith.constant 0 : index
    %2 = vector.load %arg3[%c0_2, %c0_3] : memref<1x128xf32, #tpu.memory_space<vmem>>, vector<1x128xf32>
    %3 = vector.broadcast %2 : vector<1x128xf32> to vector<32x128xf32>
    %4 = arith.mulf %1, %3 : vector<32x128xf32>
    %c0_4 = arith.constant 0 : index
    %c0_5 = arith.constant 0 : index
    %5 = vector.load %arg4[%c0_4, %c0_5] : memref<1x128xf32, #tpu.memory_space<vmem>>, vector<1x128xf32>
    %6 = vector.broadcast %5 : vector<1x128xf32> to vector<32x128xf32>
    %7 = arith.addf %4, %6 : vector<32x128xf32>
    %cst = arith.constant 0.000000e+00 : f32
    %8 = vector.broadcast %cst : f32 to vector<32x128xf32>
    %9 = arith.maximumf %7, %8 : vector<32x128xf32>
    %c0_6 = arith.constant 0 : index
    %c0_7 = arith.constant 0 : index
    %c0_8 = arith.constant 0 : index
    %10 = vector.load %arg5[%c0_6, %c0_7, %c0_8] : memref<1x32x128xf32, #tpu.memory_space<vmem>>, vector<1x32x128xf32>
    %11 = vector.shape_cast %10 : vector<1x32x128xf32> to vector<32x128xf32>
    %12 = vector.shape_cast %9 : vector<32x128xf32> to vector<1x32x128xf32>
    tpu.vector_store %arg5[%c0_6, %c0_7, %c0_8], %12 {strides = array<i32>} : memref<1x32x128xf32, #tpu.memory_space<vmem>>, vector<1x32x128xf32>,
    return
  }
  func.func @transform_0(%arg0: i32, %arg1: i32) -> (i32, i32, i32) {
    %c0_i32 = arith.constant 0 : i32
    %c0_i32_0 = arith.constant 0 : i32
    return %arg0, %arg1, %c0_i32 : i32, i32, i32
  }
  func.func @transform_1(%arg0: i32, %arg1: i32) -> (i32, i32) {
    %c0_i32 = arith.constant 0 : i32
    %c0_i32_0 = arith.constant 0 : i32
    %c0_i32_1 = arith.constant 0 : i32
    return %c0_i32, %c0_i32_0 : i32, i32
  }
  func.func @transform_2(%arg0: i32, %arg1: i32) -> (i32, i32) {
    %c0_i32 = arith.constant 0 : i32
    %c0_i32_0 = arith.constant 0 : i32
    %c0_i32_1 = arith.constant 0 : i32
    return %c0_i32, %c0_i32_0 : i32, i32
  }
  func.func @transform_3(%arg0: i32, %arg1: i32) -> (i32, i32, i32) {
    %c0_i32 = arith.constant 0 : i32
    %c0_i32_0 = arith.constant 0 : i32
    return %arg0, %arg1, %c0_i32 : i32, i32, i32
  }
}

module attributes {stable_mosaic.version = 11 : i64} {
  func.func @_matmul_stats_kernel(%arg0: i32, %arg1: i32, %arg2: memref<1x128x128xbf16, #tpu.memory_space<vmem>>, %arg3: memref<1x128x128xbf16, #tpu.memory_space<vmem>>, %arg4: memref<1x128x128xf32, #tpu.memory_space<vmem>>, %arg5: memref<1x1x1x128xf32, #tpu.memory_space<vmem>>, %arg6: memref<1x1x1x128xf32, #tpu.memory_space<vmem>>) attributes {dimension_semantics = [#tpu.dimension_semantics<parallel>, #tpu.dimension_semantics<parallel>], iteration_bounds = array<i64: 4, 1>, scalar_prefetch = 0 : i64, scratch_operands = 0 : i64, tpu.core_type = #tpu.core_type<tc>, window_params = [{transform_indices = @transform_0, window_bounds = array<i64: 1, 128, 128>}, {transform_indices = @transform_1, window_bounds = array<i64: 1, 128, 128>}, {transform_indices = @transform_2, window_bounds = array<i64: 1, 128, 128>}, {transform_indices = @transform_3, window_bounds = array<i64: 1, 1, 1, 128>}, {transform_indices = @transform_4, window_bounds = array<i64: 1, 1, 1, 128>}]} {
    %c0 = arith.constant 0 : index
    %c0_0 = arith.constant 0 : index
    %c0_1 = arith.constant 0 : index
    %0 = vector.load %arg2[%c0, %c0_0, %c0_1] : memref<1x128x128xbf16, #tpu.memory_space<vmem>>, vector<1x128x128xbf16>
    %1 = vector.shape_cast %0 : vector<1x128x128xbf16> to vector<128x128xbf16>
    %c0_2 = arith.constant 0 : index
    %c0_3 = arith.constant 0 : index
    %c0_4 = arith.constant 0 : index
    %2 = vector.load %arg3[%c0_2, %c0_3, %c0_4] : memref<1x128x128xbf16, #tpu.memory_space<vmem>>, vector<1x128x128xbf16>
    %3 = vector.shape_cast %2 : vector<1x128x128xbf16> to vector<128x128xbf16>
    %cst = arith.constant dense<0.000000e+00> : vector<128x128xf32>
    %4 = tpu.matmul %1, %3, %cst {dimension_numbers = #tpu.dot_dimension_numbers<[1], [0], [0], [1], [0, 0, 1, 1], [], []>} : vector<128x128xbf16>, vector<128x128xbf16>, vector<128x128xf32> -> vector<128x128xf32>
    %c0_5 = arith.constant 0 : index
    %c0_6 = arith.constant 0 : index
    %c0_7 = arith.constant 0 : index
    %5 = vector.load %arg4[%c0_5, %c0_6, %c0_7] : memref<1x128x128xf32, #tpu.memory_space<vmem>>, vector<1x128x128xf32>
    %6 = vector.shape_cast %5 : vector<1x128x128xf32> to vector<128x128xf32>
    %7 = vector.shape_cast %4 : vector<128x128xf32> to vector<1x128x128xf32>
    tpu.vector_store %arg4[%c0_5, %c0_6, %c0_7], %7 {strides = array<i32>} : memref<1x128x128xf32, #tpu.memory_space<vmem>>, vector<1x128x128xf32>,
    %cst_8 = arith.constant dense<0.000000e+00> : vector<128xf32>
    %8 = vector.multi_reduction <add>, %4, %cst_8 [0] : vector<128x128xf32> to vector<128xf32>
    %9 = vector.shape_cast %8 : vector<128xf32> to vector<1x128xf32>
    %10 = vector.shape_cast %9 : vector<1x128xf32> to vector<1x1x1x128xf32>
    %c0_9 = arith.constant 0 : index
    %c0_10 = arith.constant 0 : index
    %c0_11 = arith.constant 0 : index
    %c0_12 = arith.constant 0 : index
    %11 = vector.load %arg5[%c0_9, %c0_10, %c0_11, %c0_12] : memref<1x1x1x128xf32, #tpu.memory_space<vmem>>, vector<1x1x1x128xf32>
    tpu.vector_store %arg5[%c0_9, %c0_10, %c0_11, %c0_12], %10 {strides = array<i32>} : memref<1x1x1x128xf32, #tpu.memory_space<vmem>>, vector<1x1x1x128xf32>,
    %12 = arith.mulf %4, %4 : vector<128x128xf32>
    %cst_13 = arith.constant dense<0.000000e+00> : vector<128xf32>
    %13 = vector.multi_reduction <add>, %12, %cst_13 [0] : vector<128x128xf32> to vector<128xf32>
    %14 = vector.shape_cast %13 : vector<128xf32> to vector<1x128xf32>
    %15 = vector.shape_cast %14 : vector<1x128xf32> to vector<1x1x1x128xf32>
    %c0_14 = arith.constant 0 : index
    %c0_15 = arith.constant 0 : index
    %c0_16 = arith.constant 0 : index
    %c0_17 = arith.constant 0 : index
    %16 = vector.load %arg6[%c0_14, %c0_15, %c0_16, %c0_17] : memref<1x1x1x128xf32, #tpu.memory_space<vmem>>, vector<1x1x1x128xf32>
    tpu.vector_store %arg6[%c0_14, %c0_15, %c0_16, %c0_17], %15 {strides = array<i32>} : memref<1x1x1x128xf32, #tpu.memory_space<vmem>>, vector<1x1x1x128xf32>,
    return
  }
  func.func @transform_0(%arg0: i32, %arg1: i32) -> (i32, i32, i32) {
    %c0_i32 = arith.constant 0 : i32
    %c0_i32_0 = arith.constant 0 : i32
    return %arg0, %arg1, %c0_i32 : i32, i32, i32
  }
  func.func @transform_1(%arg0: i32, %arg1: i32) -> (i32, i32, i32) {
    %c0_i32 = arith.constant 0 : i32
    %c0_i32_0 = arith.constant 0 : i32
    %c0_i32_1 = arith.constant 0 : i32
    return %arg0, %c0_i32, %c0_i32_0 : i32, i32, i32
  }
  func.func @transform_2(%arg0: i32, %arg1: i32) -> (i32, i32, i32) {
    %c0_i32 = arith.constant 0 : i32
    %c0_i32_0 = arith.constant 0 : i32
    return %arg0, %arg1, %c0_i32 : i32, i32, i32
  }
  func.func @transform_3(%arg0: i32, %arg1: i32) -> (i32, i32, i32, i32) {
    %c0_i32 = arith.constant 0 : i32
    %c0_i32_0 = arith.constant 0 : i32
    %c0_i32_1 = arith.constant 0 : i32
    return %arg0, %arg1, %c0_i32, %c0_i32_0 : i32, i32, i32, i32
  }
  func.func @transform_4(%arg0: i32, %arg1: i32) -> (i32, i32, i32, i32) {
    %c0_i32 = arith.constant 0 : i32
    %c0_i32_0 = arith.constant 0 : i32
    %c0_i32_1 = arith.constant 0 : i32
    return %arg0, %arg1, %c0_i32, %c0_i32_0 : i32, i32, i32, i32
  }
}

module attributes {stable_mosaic.version = 11 : i64} {
  func.func @_scale_shift_relu_kernel(%arg0: i32, %arg1: i32, %arg2: memref<1x128x128xf32, #tpu.memory_space<vmem>>, %arg3: memref<1x128xf32, #tpu.memory_space<vmem>>, %arg4: memref<1x128xf32, #tpu.memory_space<vmem>>, %arg5: memref<1x128x128xf32, #tpu.memory_space<vmem>>) attributes {dimension_semantics = [#tpu.dimension_semantics<parallel>, #tpu.dimension_semantics<parallel>], iteration_bounds = array<i64: 4, 1>, scalar_prefetch = 0 : i64, scratch_operands = 0 : i64, tpu.core_type = #tpu.core_type<tc>, window_params = [{transform_indices = @transform_0, window_bounds = array<i64: 1, 128, 128>}, {pipeline_mode = #tpu.pipeline_mode<synchronous>, transform_indices = @transform_1, window_bounds = array<i64: 1, 128>}, {pipeline_mode = #tpu.pipeline_mode<synchronous>, transform_indices = @transform_2, window_bounds = array<i64: 1, 128>}, {transform_indices = @transform_3, window_bounds = array<i64: 1, 128, 128>}]} {
    %c0 = arith.constant 0 : index
    %c0_0 = arith.constant 0 : index
    %c0_1 = arith.constant 0 : index
    %0 = vector.load %arg2[%c0, %c0_0, %c0_1] : memref<1x128x128xf32, #tpu.memory_space<vmem>>, vector<1x128x128xf32>
    %1 = vector.shape_cast %0 : vector<1x128x128xf32> to vector<128x128xf32>
    %c0_2 = arith.constant 0 : index
    %c0_3 = arith.constant 0 : index
    %2 = vector.load %arg3[%c0_2, %c0_3] : memref<1x128xf32, #tpu.memory_space<vmem>>, vector<1x128xf32>
    %3 = vector.broadcast %2 : vector<1x128xf32> to vector<128x128xf32>
    %4 = arith.mulf %1, %3 : vector<128x128xf32>
    %c0_4 = arith.constant 0 : index
    %c0_5 = arith.constant 0 : index
    %5 = vector.load %arg4[%c0_4, %c0_5] : memref<1x128xf32, #tpu.memory_space<vmem>>, vector<1x128xf32>
    %6 = vector.broadcast %5 : vector<1x128xf32> to vector<128x128xf32>
    %7 = arith.addf %4, %6 : vector<128x128xf32>
    %cst = arith.constant 0.000000e+00 : f32
    %8 = vector.broadcast %cst : f32 to vector<128x128xf32>
    %9 = arith.maximumf %7, %8 : vector<128x128xf32>
    %c0_6 = arith.constant 0 : index
    %c0_7 = arith.constant 0 : index
    %c0_8 = arith.constant 0 : index
    %10 = vector.load %arg5[%c0_6, %c0_7, %c0_8] : memref<1x128x128xf32, #tpu.memory_space<vmem>>, vector<1x128x128xf32>
    %11 = vector.shape_cast %10 : vector<1x128x128xf32> to vector<128x128xf32>
    %12 = vector.shape_cast %9 : vector<128x128xf32> to vector<1x128x128xf32>
    tpu.vector_store %arg5[%c0_6, %c0_7, %c0_8], %12 {strides = array<i32>} : memref<1x128x128xf32, #tpu.memory_space<vmem>>, vector<1x128x128xf32>,
    return
  }
  func.func @transform_0(%arg0: i32, %arg1: i32) -> (i32, i32, i32) {
    %c0_i32 = arith.constant 0 : i32
    %c0_i32_0 = arith.constant 0 : i32
    return %arg0, %arg1, %c0_i32 : i32, i32, i32
  }
  func.func @transform_1(%arg0: i32, %arg1: i32) -> (i32, i32) {
    %c0_i32 = arith.constant 0 : i32
    %c0_i32_0 = arith.constant 0 : i32
    %c0_i32_1 = arith.constant 0 : i32
    return %c0_i32, %c0_i32_0 : i32, i32
  }
  func.func @transform_2(%arg0: i32, %arg1: i32) -> (i32, i32) {
    %c0_i32 = arith.constant 0 : i32
    %c0_i32_0 = arith.constant 0 : i32
    %c0_i32_1 = arith.constant 0 : i32
    return %c0_i32, %c0_i32_0 : i32, i32
  }
  func.func @transform_3(%arg0: i32, %arg1: i32) -> (i32, i32, i32) {
    %c0_i32 = arith.constant 0 : i32
    %c0_i32_0 = arith.constant 0 : i32
    return %arg0, %arg1, %c0_i32 : i32, i32, i32
  }
}

module attributes {stable_mosaic.version = 11 : i64} {
  func.func @_matmul_stats_kernel(%arg0: i32, %arg1: i32, %arg2: memref<1x256x128xbf16, #tpu.memory_space<vmem>>, %arg3: memref<1x128x128xbf16, #tpu.memory_space<vmem>>, %arg4: memref<1x256x128xf32, #tpu.memory_space<vmem>>, %arg5: memref<1x1x1x128xf32, #tpu.memory_space<vmem>>, %arg6: memref<1x1x1x128xf32, #tpu.memory_space<vmem>>) attributes {dimension_semantics = [#tpu.dimension_semantics<parallel>, #tpu.dimension_semantics<parallel>], iteration_bounds = array<i64: 1, 2>, scalar_prefetch = 0 : i64, scratch_operands = 0 : i64, tpu.core_type = #tpu.core_type<tc>, window_params = [{transform_indices = @transform_0, window_bounds = array<i64: 1, 256, 128>}, {transform_indices = @transform_1, window_bounds = array<i64: 1, 128, 128>}, {transform_indices = @transform_2, window_bounds = array<i64: 1, 256, 128>}, {transform_indices = @transform_3, window_bounds = array<i64: 1, 1, 1, 128>}, {transform_indices = @transform_4, window_bounds = array<i64: 1, 1, 1, 128>}]} {
    %c0 = arith.constant 0 : index
    %c0_0 = arith.constant 0 : index
    %c0_1 = arith.constant 0 : index
    %0 = vector.load %arg2[%c0, %c0_0, %c0_1] : memref<1x256x128xbf16, #tpu.memory_space<vmem>>, vector<1x256x128xbf16>
    %1 = vector.shape_cast %0 : vector<1x256x128xbf16> to vector<256x128xbf16>
    %c0_2 = arith.constant 0 : index
    %c0_3 = arith.constant 0 : index
    %c0_4 = arith.constant 0 : index
    %2 = vector.load %arg3[%c0_2, %c0_3, %c0_4] : memref<1x128x128xbf16, #tpu.memory_space<vmem>>, vector<1x128x128xbf16>
    %3 = vector.shape_cast %2 : vector<1x128x128xbf16> to vector<128x128xbf16>
    %cst = arith.constant dense<0.000000e+00> : vector<256x128xf32>
    %4 = tpu.matmul %1, %3, %cst {dimension_numbers = #tpu.dot_dimension_numbers<[1], [0], [0], [1], [0, 0, 1, 1], [], []>} : vector<256x128xbf16>, vector<128x128xbf16>, vector<256x128xf32> -> vector<256x128xf32>
    %c0_5 = arith.constant 0 : index
    %c0_6 = arith.constant 0 : index
    %c0_7 = arith.constant 0 : index
    %5 = vector.load %arg4[%c0_5, %c0_6, %c0_7] : memref<1x256x128xf32, #tpu.memory_space<vmem>>, vector<1x256x128xf32>
    %6 = vector.shape_cast %5 : vector<1x256x128xf32> to vector<256x128xf32>
    %7 = vector.shape_cast %4 : vector<256x128xf32> to vector<1x256x128xf32>
    tpu.vector_store %arg4[%c0_5, %c0_6, %c0_7], %7 {strides = array<i32>} : memref<1x256x128xf32, #tpu.memory_space<vmem>>, vector<1x256x128xf32>,
    %cst_8 = arith.constant dense<0.000000e+00> : vector<128xf32>
    %8 = vector.multi_reduction <add>, %4, %cst_8 [0] : vector<256x128xf32> to vector<128xf32>
    %9 = vector.shape_cast %8 : vector<128xf32> to vector<1x128xf32>
    %10 = vector.shape_cast %9 : vector<1x128xf32> to vector<1x1x1x128xf32>
    %c0_9 = arith.constant 0 : index
    %c0_10 = arith.constant 0 : index
    %c0_11 = arith.constant 0 : index
    %c0_12 = arith.constant 0 : index
    %11 = vector.load %arg5[%c0_9, %c0_10, %c0_11, %c0_12] : memref<1x1x1x128xf32, #tpu.memory_space<vmem>>, vector<1x1x1x128xf32>
    tpu.vector_store %arg5[%c0_9, %c0_10, %c0_11, %c0_12], %10 {strides = array<i32>} : memref<1x1x1x128xf32, #tpu.memory_space<vmem>>, vector<1x1x1x128xf32>,
    %12 = arith.mulf %4, %4 : vector<256x128xf32>
    %cst_13 = arith.constant dense<0.000000e+00> : vector<128xf32>
    %13 = vector.multi_reduction <add>, %12, %cst_13 [0] : vector<256x128xf32> to vector<128xf32>
    %14 = vector.shape_cast %13 : vector<128xf32> to vector<1x128xf32>
    %15 = vector.shape_cast %14 : vector<1x128xf32> to vector<1x1x1x128xf32>
    %c0_14 = arith.constant 0 : index
    %c0_15 = arith.constant 0 : index
    %c0_16 = arith.constant 0 : index
    %c0_17 = arith.constant 0 : index
    %16 = vector.load %arg6[%c0_14, %c0_15, %c0_16, %c0_17] : memref<1x1x1x128xf32, #tpu.memory_space<vmem>>, vector<1x1x1x128xf32>
    tpu.vector_store %arg6[%c0_14, %c0_15, %c0_16, %c0_17], %15 {strides = array<i32>} : memref<1x1x1x128xf32, #tpu.memory_space<vmem>>, vector<1x1x1x128xf32>,
    return
  }
  func.func @transform_0(%arg0: i32, %arg1: i32) -> (i32, i32, i32) {
    %c0_i32 = arith.constant 0 : i32
    %c0_i32_0 = arith.constant 0 : i32
    return %arg0, %arg1, %c0_i32 : i32, i32, i32
  }
  func.func @transform_1(%arg0: i32, %arg1: i32) -> (i32, i32, i32) {
    %c0_i32 = arith.constant 0 : i32
    %c0_i32_0 = arith.constant 0 : i32
    %c0_i32_1 = arith.constant 0 : i32
    return %arg0, %c0_i32, %c0_i32_0 : i32, i32, i32
  }
  func.func @transform_2(%arg0: i32, %arg1: i32) -> (i32, i32, i32) {
    %c0_i32 = arith.constant 0 : i32
    %c0_i32_0 = arith.constant 0 : i32
    return %arg0, %arg1, %c0_i32 : i32, i32, i32
  }
  func.func @transform_3(%arg0: i32, %arg1: i32) -> (i32, i32, i32, i32) {
    %c0_i32 = arith.constant 0 : i32
    %c0_i32_0 = arith.constant 0 : i32
    %c0_i32_1 = arith.constant 0 : i32
    return %arg0, %arg1, %c0_i32, %c0_i32_0 : i32, i32, i32, i32
  }
  func.func @transform_4(%arg0: i32, %arg1: i32) -> (i32, i32, i32, i32) {
    %c0_i32 = arith.constant 0 : i32
    %c0_i32_0 = arith.constant 0 : i32
    %c0_i32_1 = arith.constant 0 : i32
    return %arg0, %arg1, %c0_i32, %c0_i32_0 : i32, i32, i32, i32
  }
}

module attributes {stable_mosaic.version = 11 : i64} {
  func.func @_scale_shift_relu_kernel(%arg0: i32, %arg1: i32, %arg2: memref<1x256x128xf32, #tpu.memory_space<vmem>>, %arg3: memref<1x128xf32, #tpu.memory_space<vmem>>, %arg4: memref<1x128xf32, #tpu.memory_space<vmem>>, %arg5: memref<1x256x128xf32, #tpu.memory_space<vmem>>) attributes {dimension_semantics = [#tpu.dimension_semantics<parallel>, #tpu.dimension_semantics<parallel>], iteration_bounds = array<i64: 1, 2>, scalar_prefetch = 0 : i64, scratch_operands = 0 : i64, tpu.core_type = #tpu.core_type<tc>, window_params = [{transform_indices = @transform_0, window_bounds = array<i64: 1, 256, 128>}, {pipeline_mode = #tpu.pipeline_mode<synchronous>, transform_indices = @transform_1, window_bounds = array<i64: 1, 128>}, {pipeline_mode = #tpu.pipeline_mode<synchronous>, transform_indices = @transform_2, window_bounds = array<i64: 1, 128>}, {transform_indices = @transform_3, window_bounds = array<i64: 1, 256, 128>}]} {
    %c0 = arith.constant 0 : index
    %c0_0 = arith.constant 0 : index
    %c0_1 = arith.constant 0 : index
    %0 = vector.load %arg2[%c0, %c0_0, %c0_1] : memref<1x256x128xf32, #tpu.memory_space<vmem>>, vector<1x256x128xf32>
    %1 = vector.shape_cast %0 : vector<1x256x128xf32> to vector<256x128xf32>
    %c0_2 = arith.constant 0 : index
    %c0_3 = arith.constant 0 : index
    %2 = vector.load %arg3[%c0_2, %c0_3] : memref<1x128xf32, #tpu.memory_space<vmem>>, vector<1x128xf32>
    %3 = vector.broadcast %2 : vector<1x128xf32> to vector<256x128xf32>
    %4 = arith.mulf %1, %3 : vector<256x128xf32>
    %c0_4 = arith.constant 0 : index
    %c0_5 = arith.constant 0 : index
    %5 = vector.load %arg4[%c0_4, %c0_5] : memref<1x128xf32, #tpu.memory_space<vmem>>, vector<1x128xf32>
    %6 = vector.broadcast %5 : vector<1x128xf32> to vector<256x128xf32>
    %7 = arith.addf %4, %6 : vector<256x128xf32>
    %cst = arith.constant 0.000000e+00 : f32
    %8 = vector.broadcast %cst : f32 to vector<256x128xf32>
    %9 = arith.maximumf %7, %8 : vector<256x128xf32>
    %c0_6 = arith.constant 0 : index
    %c0_7 = arith.constant 0 : index
    %c0_8 = arith.constant 0 : index
    %10 = vector.load %arg5[%c0_6, %c0_7, %c0_8] : memref<1x256x128xf32, #tpu.memory_space<vmem>>, vector<1x256x128xf32>
    %11 = vector.shape_cast %10 : vector<1x256x128xf32> to vector<256x128xf32>
    %12 = vector.shape_cast %9 : vector<256x128xf32> to vector<1x256x128xf32>
    tpu.vector_store %arg5[%c0_6, %c0_7, %c0_8], %12 {strides = array<i32>} : memref<1x256x128xf32, #tpu.memory_space<vmem>>, vector<1x256x128xf32>,
    return
  }
  func.func @transform_0(%arg0: i32, %arg1: i32) -> (i32, i32, i32) {
    %c0_i32 = arith.constant 0 : i32
    %c0_i32_0 = arith.constant 0 : i32
    return %arg0, %arg1, %c0_i32 : i32, i32, i32
  }
  func.func @transform_1(%arg0: i32, %arg1: i32) -> (i32, i32) {
    %c0_i32 = arith.constant 0 : i32
    %c0_i32_0 = arith.constant 0 : i32
    %c0_i32_1 = arith.constant 0 : i32
    return %c0_i32, %c0_i32_0 : i32, i32
  }
  func.func @transform_2(%arg0: i32, %arg1: i32) -> (i32, i32) {
    %c0_i32 = arith.constant 0 : i32
    %c0_i32_0 = arith.constant 0 : i32
    %c0_i32_1 = arith.constant 0 : i32
    return %c0_i32, %c0_i32_0 : i32, i32
  }
  func.func @transform_3(%arg0: i32, %arg1: i32) -> (i32, i32, i32) {
    %c0_i32 = arith.constant 0 : i32
    %c0_i32_0 = arith.constant 0 : i32
    return %arg0, %arg1, %c0_i32 : i32, i32, i32
  }
}

module attributes {stable_mosaic.version = 11 : i64} {
  func.func @_matmul_act_kernel(%arg0: i32, %arg1: i32, %arg2: memref<1x256x128xbf16, #tpu.memory_space<vmem>>, %arg3: memref<1x128x128xbf16, #tpu.memory_space<vmem>>, %arg4: memref<1x256x128xf32, #tpu.memory_space<vmem>>) attributes {dimension_semantics = [#tpu.dimension_semantics<parallel>, #tpu.dimension_semantics<parallel>], iteration_bounds = array<i64: 4, 2>, scalar_prefetch = 0 : i64, scratch_operands = 0 : i64, tpu.core_type = #tpu.core_type<tc>, window_params = [{transform_indices = @transform_0, window_bounds = array<i64: 1, 256, 128>}, {transform_indices = @transform_1, window_bounds = array<i64: 1, 128, 128>}, {transform_indices = @transform_2, window_bounds = array<i64: 1, 256, 128>}]} {
    %c0 = arith.constant 0 : index
    %c0_0 = arith.constant 0 : index
    %c0_1 = arith.constant 0 : index
    %0 = vector.load %arg2[%c0, %c0_0, %c0_1] : memref<1x256x128xbf16, #tpu.memory_space<vmem>>, vector<1x256x128xbf16>
    %1 = vector.shape_cast %0 : vector<1x256x128xbf16> to vector<256x128xbf16>
    %c0_2 = arith.constant 0 : index
    %c0_3 = arith.constant 0 : index
    %c0_4 = arith.constant 0 : index
    %2 = vector.load %arg3[%c0_2, %c0_3, %c0_4] : memref<1x128x128xbf16, #tpu.memory_space<vmem>>, vector<1x128x128xbf16>
    %3 = vector.shape_cast %2 : vector<1x128x128xbf16> to vector<128x128xbf16>
    %cst = arith.constant dense<0.000000e+00> : vector<256x128xf32>
    %4 = tpu.matmul %1, %3, %cst {dimension_numbers = #tpu.dot_dimension_numbers<[1], [0], [0], [1], [0, 0, 1, 1], [], []>} : vector<256x128xbf16>, vector<128x128xbf16>, vector<256x128xf32> -> vector<256x128xf32>
    %5 = math.tanh %4 : vector<256x128xf32>
    %c0_5 = arith.constant 0 : index
    %c0_6 = arith.constant 0 : index
    %c0_7 = arith.constant 0 : index
    %6 = vector.load %arg4[%c0_5, %c0_6, %c0_7] : memref<1x256x128xf32, #tpu.memory_space<vmem>>, vector<1x256x128xf32>
    %7 = vector.shape_cast %6 : vector<1x256x128xf32> to vector<256x128xf32>
    %8 = vector.shape_cast %5 : vector<256x128xf32> to vector<1x256x128xf32>
    tpu.vector_store %arg4[%c0_5, %c0_6, %c0_7], %8 {strides = array<i32>} : memref<1x256x128xf32, #tpu.memory_space<vmem>>, vector<1x256x128xf32>,
    return
  }
  func.func @transform_0(%arg0: i32, %arg1: i32) -> (i32, i32, i32) {
    %c0_i32 = arith.constant 0 : i32
    %c0_i32_0 = arith.constant 0 : i32
    return %arg0, %arg1, %c0_i32 : i32, i32, i32
  }
  func.func @transform_1(%arg0: i32, %arg1: i32) -> (i32, i32, i32) {
    %c0_i32 = arith.constant 0 : i32
    %c0_i32_0 = arith.constant 0 : i32
    %c0_i32_1 = arith.constant 0 : i32
    return %arg0, %c0_i32, %c0_i32_0 : i32, i32, i32
  }
  func.func @transform_2(%arg0: i32, %arg1: i32) -> (i32, i32, i32) {
    %c0_i32 = arith.constant 0 : i32
    %c0_i32_0 = arith.constant 0 : i32
    return %arg0, %arg1, %c0_i32 : i32, i32, i32
  }
}

</mosaic_0001>

<bundles_post_ra>
// kernel: netG_forward.12
= control target key start
LH: loop header
LB: loop body
LE: loop exit
PB: predicated region body
PF: predicated region fallthrough
CT: control target
= control target key end

     0   :  { %s104_s0 = inlined_call_operand.vmem [shape: f32[1,32,128], index: 0, kind: input, shape index: {}]   ;;  %s105_s1 = inlined_call_operand.vmem [shape: f32[1,128], index: 1, kind: input, shape index: {}]   ;;  %s106_s2 = inlined_call_operand.vmem [shape: f32[1,128], index: 2, kind: input, shape index: {}]   ;;  %s107_s3 = inlined_call_operand.vmem [shape: f32[1,32,128], index: 3, kind: output, shape index: {}]  }
   0x1   :  { %v14_v0 = vld [vmem:[%s104_s0] sm:$0xff]  ;;  %v15_v4 = vld [vmem:[%s104_s0 + $0x8] sm:$0xff]  ;;  %v16_v5 = vld [vmem:[%s104_s0 + $0x10] sm:$0xff] }
   0x2   :  { %v52_v1 = vld [vmem:[%s105_s1] ss:$0 sm:$0xff]  ;;  %v17_v6 = vld [vmem:[%s104_s0 + $0x18] sm:$0xff] }
   0x3   :  { %v53_v2 = vld [vmem:[%s106_s2] ss:$0 sm:$0xff]  ;;  %v25_v3 = vmul.f32 %v52_v1, %v14_v0  ;;  %v26_v7 = vmul.f32 %v52_v1, %v15_v4  ;;  %v27_v8 = vmul.f32 %v52_v1, %v16_v5  ;;  %v28_v9 = vmul.f32 %v52_v1, %v17_v6 }
   0x5   :  { %v36_v10 = vadd.f32 %v53_v2, %v25_v3  ;;  %v37_v11 = vadd.f32 %v53_v2, %v26_v7  ;;  %v38_v12 = vadd.f32 %v53_v2, %v27_v8  ;;  %v39_v13 = vadd.f32 %v53_v2, %v28_v9 }
   0x7   :  { %v40_v14 = vmax.f32 %v36_v10, 0.0  ;;  %v41_v15 = vmax.f32 %v37_v11, 0.0  ;;  %v42_v16 = vmax.f32 %v38_v12, 0.0  ;;  %v43_v17 = vmax.f32 %v39_v13, 0.0 }
   0x9   :  { %44 = vst [vmem:[%s107_s3] sm:$0xff] %v40_v14  ;;  %45 = vst [vmem:[%s107_s3 + $0x8] sm:$0xff] %v41_v15 }
   0xa   :  { %46 = vst [vmem:[%s107_s3 + $0x10] sm:$0xff] %v42_v16  ;;  %47 = vst [vmem:[%s107_s3 + $0x18] sm:$0xff] %v43_v17 }

// kernel: netG_forward.11
= control target key start
LH: loop header
LB: loop body
LE: loop exit
PB: predicated region body
PF: predicated region fallthrough
CT: control target
= control target key end

     0   :  { %s307_s1 = inlined_call_operand.vmem [shape: bf16[1,128,128], index: 1, kind: input, shape index: {}]   ;;  %s308_s0 = inlined_call_operand.vmem [shape: bf16[1,32,128], index: 0, kind: input, shape index: {}]   ;;  %s309_s2 = inlined_call_operand.vmem [shape: f32[1,32,128], index: 2, kind: output, shape index: {0}]   ;;  %s310_s3 = inlined_call_operand.vmem [shape: f32[1,1,1,128], index: 3, kind: output, shape index: {1}]   ;;  %s311_s4 = inlined_call_operand.vmem [shape: f32[1,1,1,128], index: 4, kind: output, shape index: {2}]  }
   0x1   :  { %v224_v0 = vld [vmem:[%s307_s1 + $0x38] sm:$0xff]   ;;  %v225_v1 = vld [vmem:[%s307_s1 + $0x30] sm:$0xff]   ;;  %v226_v2 = vld [vmem:[%s307_s1 + $0x28] sm:$0xff]  }
   0x2   :  { %204 = vmatprep.subr.bf16.mxu0 %v224_v0  ;;  %v227_v3 = vld [vmem:[%s307_s1 + $0x20] sm:$0xff]   ;;  %v228_v5 = vld [vmem:[%s307_s1 + $0x18] sm:$0xff]   ;;  %v229_v6 = vld [vmem:[%s307_s1 + $0x10] sm:$0xff]  }
   0x3   :  { %205 = vmatpush3.bf16.msra.mxu0 %v224_v0  ;;  %v232_v4 = vld [vmem:[%s308_s0] sm:$0xff]   ;;  %v230_v7 = vld [vmem:[%s307_s1 + $0x8] sm:$0xff]  }
   0x4   :  { %206 = vmatprep.subr.bf16.mxu0 %v225_v1  ;;  %220 = vmatprep.mubr.bf16.mxu0 %v232_v4  ;;  %v231_v8 = vld [vmem:[%s307_s1] sm:$0xff]   ;;  %v233_v9 = vld [vmem:[%s308_s0 + $0x8] sm:$0xff]  }
   0x7   :  { %207 = vmatpush3.bf16.msra.mxu0 %v225_v1 }
   0x8   :  { %208 = vmatprep.subr.bf16.mxu0 %v226_v2 }
   0xb   :  { %209 = vmatpush3.bf16.msra.mxu0 %v226_v2 }
   0xc   :  { %210 = vmatprep.subr.bf16.mxu0 %v227_v3 }
   0xf   :  { %211 = vmatpush3.bf16.msra.mxu0 %v227_v3 }
  0x10   :  { %212 = vmatprep.subr.bf16.mxu0 %v228_v5 }
  0x13   :  { %213 = vmatpush3.bf16.msra.mxu0 %v228_v5 }
  0x14   :  { %214 = vmatprep.subr.bf16.mxu0 %v229_v6 }
  0x17   :  { %215 = vmatpush3.bf16.msra.mxu0 %v229_v6 }
  0x18   :  { %216 = vmatprep.subr.bf16.mxu0 %v230_v7 }
  0x1b   :  { %217 = vmatpush3.bf16.msra.mxu0 %v230_v7 }
  0x1c   :  { %218 = vmatprep.subr.bf16.mxu0 %v231_v8 }
  0x1f   :  { %219 = vmatpush3.bf16.msra.mxu0 %v231_v8 }
  0x22   :  { %221 = vmatmul.mubr.bf16.vlgmr.msra.gmra.mxu0 %v233_v9 }
  0xe2   :  { %v222_v10 = vpop.f32.mrf.mxu0 }
  0xe3   :  { %146 = vst [vmem:[%s309_s2 + $0x10] sm:$0xff] %v222_v10  ;;  %v160_v17 = vmul.f32 %v222_v10, %v222_v10 }
  0xe4   :  { %v129_v11 = vpop.f32.mrf.mxu0 }
  0xe5   :  { %144 = vst [vmem:[%s309_s2] sm:$0xff] %v129_v11  ;;  %v158_v14 = vmul.f32 %v129_v11, %v129_v11 }
  0xe6   :  { %v223_v12 = vpop.f32.mrf.mxu0 }
  0xe7   :  { %147 = vst [vmem:[%s309_s2 + $0x18] sm:$0xff] %v223_v12  ;;  %v161_v20 = vmul.f32 %v223_v12, %v223_v12 }
  0xe8   :  { %v132_v13 = vpop.f32.mrf.mxu0 }
  0xe9   :  { %145 = vst [vmem:[%s309_s2 + $0x8] sm:$0xff] %v132_v13  ;;  %v148_v15 = vadd.f32 %v132_v13, %v129_v11  ;;  %v159_v16 = vmul.f32 %v132_v13, %v132_v13 }
  0xeb   :  { %v149_v18 = vadd.f32 %v222_v10, %v148_v15  ;;  %v162_v19 = vadd.f32 %v159_v16, %v158_v14 }
  0xed   :  { %v150_v21 = vadd.f32 %v223_v12, %v149_v18  ;;  %v163_v22 = vadd.f32 %v162_v19, %v160_v17 }
  0xef   :  { %v151_v23 = vrot.slane %v150_v21, 4  ;;  %v164_v24 = vadd.f32 %v163_v22, %v161_v20 }
  0xf1   :  { %v152_v25 = vadd.f32 %v151_v23, %v150_v21  ;;  %v165_v26 = vrot.slane %v164_v24, 4 }
  0xf3   :  { %v153_v27 = vrot.slane %v152_v25, 2  ;;  %v166_v28 = vadd.f32 %v165_v26, %v164_v24 }
  0xf5   :  { %v154_v29 = vadd.f32 %v153_v27, %v152_v25  ;;  %v167_v30 = vrot.slane %v166_v28, 2 }
  0xf7   :  { %v155_v31 = vrot.slane %v154_v29, 1  ;;  %v168_v32 = vadd.f32 %v167_v30, %v166_v28 }
  0xf9   :  { %v156_v33 = vadd.f32 %v155_v31, %v154_v29  ;;  %v169_v34 = vrot.slane %v168_v32, 1 }
  0xfb   :  { %157 = vst [vmem:[%s310_s3] sm:$0x1] %v156_v33  ;;  %v170_v35 = vadd.f32 %v169_v34, %v168_v32 }
  0xfd   :  { %171 = vst [vmem:[%s311_s4] sm:$0x1] %v170_v35 }

// kernel: netG_forward.13
= control target key start
LH: loop header
LB: loop body
LE: loop exit
PB: predicated region body
PF: predicated region fallthrough
CT: control target
= control target key end

     0   :  { %s756_s15 = smov 0   ;;  %s758_s16 = smov 0   ;;  %s805_s0 = inlined_call_operand.vmem [shape: bf16[4,32,128], index: 0, kind: input, shape index: {}]   ;;  %s806_s1 = inlined_call_operand.vmem [shape: bf16[4,128,128], index: 1, kind: input, shape index: {}]   ;;  %s807_s2 = inlined_call_operand.vmem [shape: f32[4,32,128], index: 2, kind: output, shape index: {0}]   ;;  %s808_s3 = inlined_call_operand.vmem [shape: f32[4,1,1,128], index: 3, kind: output, shape index: {1}]   ;;  %s809_s4 = inlined_call_operand.vmem [shape: f32[4,1,1,128], index: 4, kind: output, shape index: {2}]  }
   0x1   :  { %s760_s17 = smov 0  }
   0x2 LB: > { %s27_s18 = sadd.s32 1, %s725_s16  ;;  %p621_p0 = scmp.ge.s32.totalorder %s729_s17, 1  ;;  %s729_s17 = sphi %s760_s17, %s15_s17   ;;  %s725_s16 = sphi %s758_s16, %s811_s16   ;;  %s721_s15 = sphi %s756_s15, %s810_s15  }
   0x3   : > { %p29_p1 = scmp.ge.s32.totalorder %s27_s18, 4  ;;  %p202_p2 = scmp.lt.s32.totalorder %s729_s17, 5 }
   0x5   : > { %s813_s18 = smov (%p29_p1, %s27_s18), 0  ;;  %p203_p3 = pnand %p621_p0, %p202_p2 }
   0x6   : > { %p254_p4 = scmp.lt.s32.totalorder (!%p203_p3), %s721_s15, 3 }
   0x7   : > { %206 = sbr.rel (%p203_p3) target bundleno = 268 (0x10c), region = 28 }
   0xc   : > { %s815_s15 = smov (!%p254_p4, %s721_s15), 3 }
   0xd   : > { %s641_s19 = sshll.u32 %s815_s15, 6  ;;  %s640_s23 = sshll.u32 %s815_s15, 4 }
   0xe   : > { %s267_s22 = scalar_lea.vmem %s806_s1, %s641_s19  ;;  %s261_s26 = scalar_lea.vmem %s805_s0, %s640_s23 }
   0xf   : > { %v697_v0 = vld [vmem:[%s267_s22 + $0x38] sm:$0xff]   ;;  %v698_v1 = vld [vmem:[%s267_s22 + $0x30] sm:$0xff]   ;;  %v699_v2 = vld [vmem:[%s267_s22 + $0x28] sm:$0xff]   ;;  %s642_s27 = sshll.u32 %s815_s15, 5  ;;  %s283_s7 = scalar_lea.vmem %s808_s3, %s815_s15 }
  0x10   : > { %653 = vmatprep.subr.bf16.mxu0 %v697_v0  ;;  %v700_v3 = vld [vmem:[%s267_s22 + $0x20] sm:$0xff]   ;;  %v701_v5 = vld [vmem:[%s267_s22 + $0x18] sm:$0xff]   ;;  %v702_v6 = vld [vmem:[%s267_s22 + $0x10] sm:$0xff]   ;;  %s276_s30 = scalar_lea.vmem %s807_s2, %s642_s27  ;;  %s289_s10 = scalar_lea.vmem %s809_s4, %s815_s15 }
  0x11   : > { %654 = vmatpush3.bf16.msra.mxu0 %v697_v0  ;;  %v705_v4 = vld [vmem:[%s261_s26] sm:$0xff]   ;;  %v703_v7 = vld [vmem:[%s267_s22 + $0x8] sm:$0xff]  }
  0x12   : > { %655 = vmatprep.subr.bf16.mxu0 %v698_v1  ;;  %669 = vmatprep.mubr.bf16.mxu0 %v705_v4  ;;  %v704_v8 = vld [vmem:[%s267_s22] sm:$0xff]   ;;  %v706_v9 = vld [vmem:[%s261_s26 + $0x8] sm:$0xff]  }
  0x15   : > { %656 = vmatpush3.bf16.msra.mxu0 %v698_v1 }
  0x16   : > { %657 = vmatprep.subr.bf16.mxu0 %v699_v2 }
  0x19   : > { %658 = vmatpush3.bf16.msra.mxu0 %v699_v2 }
  0x1a   : > { %659 = vmatprep.subr.bf16.mxu0 %v700_v3 }
  0x1d   : > { %660 = vmatpush3.bf16.msra.mxu0 %v700_v3 }
  0x1e   : > { %661 = vmatprep.subr.bf16.mxu0 %v701_v5 }
  0x21   : > { %662 = vmatpush3.bf16.msra.mxu0 %v701_v5 }
  0x22   : > { %663 = vmatprep.subr.bf16.mxu0 %v702_v6 }
  0x25   : > { %664 = vmatpush3.bf16.msra.mxu0 %v702_v6 }
  0x26   : > { %665 = vmatprep.subr.bf16.mxu0 %v703_v7 }
  0x29   : > { %666 = vmatpush3.bf16.msra.mxu0 %v703_v7 }
  0x2a   : > { %667 = vmatprep.subr.bf16.mxu0 %v704_v8 }
  0x2d   : > { %668 = vmatpush3.bf16.msra.mxu0 %v704_v8 }
  0x30   : > { %670 = vmatmul.mubr.bf16.vlgmr.msra.gmra.mxu0 %v706_v9 }
  0xf0   : > { %v671_v10 = vpop.f32.mrf.mxu0 }
  0xf1   : > { %422 = vst [vmem:[%s276_s30 + $0x10] sm:$0xff] %v671_v10  ;;  %v436_v17 = vmul.f32 %v671_v10, %v671_v10 }
  0xf2   : > { %v405_v11 = vpop.f32.mrf.mxu0 }
  0xf3   : > { %420 = vst [vmem:[%s276_s30] sm:$0xff] %v405_v11  ;;  %v434_v14 = vmul.f32 %v405_v11, %v405_v11 }
  0xf4   : > { %v672_v12 = vpop.f32.mrf.mxu0 }
  0xf5   : > { %423 = vst [vmem:[%s276_s30 + $0x18] sm:$0xff] %v672_v12  ;;  %v437_v20 = vmul.f32 %v672_v12, %v672_v12 }
  0xf6   : > { %v408_v13 = vpop.f32.mrf.mxu0 }
  0xf7   : > { %421 = vst [vmem:[%s276_s30 + $0x8] sm:$0xff] %v408_v13  ;;  %v424_v15 = vadd.f32 %v408_v13, %v405_v11  ;;  %v435_v16 = vmul.f32 %v408_v13, %v408_v13 }
  0xf9   : > { %v425_v18 = vadd.f32 %v671_v10, %v424_v15  ;;  %v438_v19 = vadd.f32 %v435_v16, %v434_v14 }
  0xfb   : > { %v426_v21 = vadd.f32 %v672_v12, %v425_v18  ;;  %v439_v22 = vadd.f32 %v438_v19, %v436_v17 }
  0xfd   : > { %v427_v23 = vrot.slane %v426_v21, 4  ;;  %v440_v24 = vadd.f32 %v439_v22, %v437_v20 }
  0xff   : > { %v428_v25 = vadd.f32 %v427_v23, %v426_v21  ;;  %v441_v26 = vrot.slane %v440_v24, 4 }
 0x101   : > { %v429_v27 = vrot.slane %v428_v25, 2  ;;  %v442_v28 = vadd.f32 %v441_v26, %v440_v24 }
 0x103   : > { %v430_v29 = vadd.f32 %v429_v27, %v428_v25  ;;  %v443_v30 = vrot.slane %v442_v28, 2 }
 0x105   : > { %v431_v31 = vrot.slane %v430_v29, 1  ;;  %v444_v32 = vadd.f32 %v443_v30, %v442_v28 }
 0x107   : > { %v432_v33 = vadd.f32 %v431_v31, %v430_v29  ;;  %v445_v34 = vrot.slane %v444_v32, 1 }
 0x109   : > { %433 = vst [vmem:[%s283_s7] sm:$0x1] %v432_v33  ;;  %v446_v35 = vadd.f32 %v445_v34, %v444_v32 }
 0x10b   : > { %447 = vst [vmem:[%s289_s10] sm:$0x1] %v446_v35 }
 0x10c PF: > { %s15_s17 = sadd.s32 1, %s729_s17   ;;  %s810_s15 = smov %s725_s16 }
 0x10d   : > { %p12_p5 = scmp.ge.s32.totalorder %s15_s17, 6   ;;  %s811_s16 = smov %s813_s18 }
 0x10f   :  { %14 = sbr.rel (!%p12_p5) target bundleno = 2 (0x2), region = 85 }

// kernel: netG_forward.14
= control target key start
LH: loop header
LB: loop body
LE: loop exit
PB: predicated region body
PF: predicated region fallthrough
CT: control target
= control target key end

     0   :  { %s414_s12 = smov 0   ;;  %s416_s13 = smov 0   ;;  %s453_s0 = inlined_call_operand.vmem [shape: f32[4,32,128], index: 0, kind: input, shape index: {}]   ;;  %s454_s1 = inlined_call_operand.vmem [shape: f32[1,128], index: 1, kind: input, shape index: {}]   ;;  %s455_s2 = inlined_call_operand.vmem [shape: f32[1,128], index: 2, kind: input, shape index: {}]   ;;  %s456_s3 = inlined_call_operand.vmem [shape: f32[4,32,128], index: 3, kind: output, shape index: {}]  }
   0x1   :  { %s418_s14 = smov 0  }
   0x2 LB: > { %s25_s15 = sadd.s32 1, %s388_s13  ;;  %p335_p0 = scmp.ge.s32.totalorder %s392_s14, 1  ;;  %s392_s14 = sphi %s418_s14, %s13_s14   ;;  %s388_s13 = sphi %s416_s13, %s458_s13   ;;  %s384_s12 = sphi %s414_s12, %s457_s12  }
   0x3   : > { %p27_p1 = scmp.ge.s32.totalorder %s25_s15, 4  ;;  %p158_p2 = scmp.lt.s32.totalorder %s392_s14, 5 }
   0x5   : > { %s460_s15 = smov (%p27_p1, %s25_s15), 0  ;;  %p159_p3 = pnand %p335_p0, %p158_p2 }
   0x6   : > { %p191_p4 = scmp.lt.s32.totalorder (!%p159_p3), %s384_s12, 3 }
   0x7   : > { %162 = sbr.rel (%p159_p3) target bundleno = 24 (0x18), region = 32 }
   0xc   : > { %s462_s12 = smov (!%p191_p4, %s384_s12), 3  ;;  %v340_v0 = vld [vmem:[%s454_s1] ss:$0 sm:$0xff] }
   0xd   : > { %s344_s16 = sshll.u32 %s462_s12, 5  ;;  %v341_v1 = vld [vmem:[%s455_s2] ss:$0 sm:$0xff] }
   0xe   : > { %s198_s21 = scalar_lea.vmem %s453_s0, %s344_s16  ;;  %s208_s26 = scalar_lea.vmem %s456_s3, %s344_s16 }
   0xf   : > { %v210_v2 = vld [vmem:[%s198_s21] sm:$0xff]  ;;  %v211_v3 = vld [vmem:[%s198_s21 + $0x8] sm:$0xff]  ;;  %v212_v4 = vld [vmem:[%s198_s21 + $0x10] sm:$0xff] }
  0x10   : > { %v221_v5 = vmul.f32 %v340_v0, %v210_v2  ;;  %v222_v6 = vmul.f32 %v340_v0, %v211_v3  ;;  %v223_v7 = vmul.f32 %v340_v0, %v212_v4  ;;  %v213_v8 = vld [vmem:[%s198_s21 + $0x18] sm:$0xff] }
  0x11   : > { %v224_v9 = vmul.f32 %v340_v0, %v213_v8 }
  0x12   : > { %v232_v10 = vadd.f32 %v341_v1, %v221_v5  ;;  %v233_v11 = vadd.f32 %v341_v1, %v222_v6  ;;  %v234_v12 = vadd.f32 %v341_v1, %v223_v7 }
  0x13   : > { %v235_v13 = vadd.f32 %v341_v1, %v224_v9 }
  0x14   : > { %v236_v14 = vmax.f32 %v232_v10, 0.0  ;;  %v237_v15 = vmax.f32 %v233_v11, 0.0  ;;  %v238_v16 = vmax.f32 %v234_v12, 0.0 }
  0x15   : > { %v239_v17 = vmax.f32 %v235_v13, 0.0 }
  0x16   : > { %240 = vst [vmem:[%s208_s26] sm:$0xff] %v236_v14  ;;  %241 = vst [vmem:[%s208_s26 + $0x8] sm:$0xff] %v237_v15 }
  0x17   : > { %242 = vst [vmem:[%s208_s26 + $0x10] sm:$0xff] %v238_v16  ;;  %243 = vst [vmem:[%s208_s26 + $0x18] sm:$0xff] %v239_v17 }
  0x18 PF: > { %s13_s14 = sadd.s32 1, %s392_s14   ;;  %s457_s12 = smov %s388_s13 }
  0x19   : > { %p10_p5 = scmp.ge.s32.totalorder %s13_s14, 6   ;;  %s458_s13 = smov %s460_s15 }
  0x1b   :  { %12 = sbr.rel (!%p10_p5) target bundleno = 2 (0x2), region = 62 }

// kernel: netG_forward.16
= control target key start
LH: loop header
LB: loop body
LE: loop exit
PB: predicated region body
PF: predicated region fallthrough
CT: control target
= control target key end

     0   :  { %s474_s12 = smov 0   ;;  %s476_s13 = smov 0   ;;  %s585_s0 = inlined_call_operand.vmem [shape: f32[4,128,128], index: 0, kind: input, shape index: {}]   ;;  %s586_s1 = inlined_call_operand.vmem [shape: f32[1,128], index: 1, kind: input, shape index: {}]   ;;  %s587_s2 = inlined_call_operand.vmem [shape: f32[1,128], index: 2, kind: input, shape index: {}]   ;;  %s588_s3 = inlined_call_operand.vmem [shape: f32[4,128,128], index: 3, kind: output, shape index: {}]  }
   0x1   :  { %s478_s14 = smov 0  }
   0x2 LB: > { %s25_s15 = sadd.s32 1, %s448_s13  ;;  %p395_p0 = scmp.ge.s32.totalorder %s452_s14, 1  ;;  %s452_s14 = sphi %s478_s14, %s13_s14   ;;  %s448_s13 = sphi %s476_s13, %s590_s13   ;;  %s444_s12 = sphi %s474_s12, %s589_s12  }
   0x3   : > { %p27_p1 = scmp.ge.s32.totalorder %s25_s15, 4  ;;  %p158_p2 = scmp.lt.s32.totalorder %s452_s14, 5 }
   0x5   : > { %s592_s15 = smov (%p27_p1, %s25_s15), 0  ;;  %p159_p3 = pnand %p395_p0, %p158_p2 }
   0x6   : > { %p191_p4 = scmp.lt.s32.totalorder (!%p159_p3), %s444_s12, 3 }
   0x7   : > { %162 = sbr.rel (%p159_p3) target bundleno = 33 (0x21), region = 32 }
   0xc   : > { %s594_s12 = smov (!%p191_p4, %s444_s12), 3  ;;  %v495_v0 = vld [vmem:[%s586_s1] ss:$0 sm:$0xff] }
   0xd   : > { %s404_s16 = sshll.u32 %s594_s12, 7  ;;  %v505_v1 = vld [vmem:[%s587_s2] ss:$0 sm:$0xff] }
   0xe   : > { %s500_s21 = scalar_lea.vmem %s585_s0, %s404_s16  ;;  %s528_s26 = scalar_lea.vmem %s588_s3, %s404_s16 }
   0xf   : > { %v210_v2 = vld [vmem:[%s500_s21] sm:$0xff]  ;;  %v211_v3 = vld [vmem:[%s500_s21 + $0x8] sm:$0xff]  ;;  %v212_v4 = vld [vmem:[%s500_s21 + $0x10] sm:$0xff] }
  0x10   : > { %v233_v5 = vmul.f32 %v495_v0, %v210_v2  ;;  %v234_v6 = vmul.f32 %v495_v0, %v211_v3  ;;  %v235_v7 = vmul.f32 %v495_v0, %v212_v4  ;;  %v213_v8 = vld [vmem:[%s500_s21 + $0x18] sm:$0xff]  ;;  %v214_v9 = vld [vmem:[%s500_s21 + $0x20] sm:$0xff]  ;;  %v215_v10 = vld [vmem:[%s500_s21 + $0x28] sm:$0xff] }
  0x11   : > { %v236_v11 = vmul.f32 %v495_v0, %v213_v8  ;;  %v237_v12 = vmul.f32 %v495_v0, %v214_v9  ;;  %v238_v13 = vmul.f32 %v495_v0, %v215_v10  ;;  %v216_v14 = vld [vmem:[%s500_s21 + $0x30] sm:$0xff]  ;;  %v217_v15 = vld [vmem:[%s500_s21 + $0x38] sm:$0xff]  ;;  %v218_v24 = vld [vmem:[%s500_s21 + $0x40] sm:$0xff] }
  0x12   : > { %v256_v16 = vadd.f32 %v505_v1, %v233_v5  ;;  %v257_v17 = vadd.f32 %v505_v1, %v234_v6  ;;  %v258_v18 = vadd.f32 %v505_v1, %v235_v7  ;;  %v239_v19 = vmul.f32 %v495_v0, %v216_v14  ;;  %v219_v25 = vld [vmem:[%s500_s21 + $0x48] sm:$0xff]  ;;  %v220_v26 = vld [vmem:[%s500_s21 + $0x50] sm:$0xff]  ;;  %v221_v31 = vld [vmem:[%s500_s21 + $0x58] sm:$0xff] }
  0x13   : > { %v259_v20 = vadd.f32 %v505_v1, %v236_v11  ;;  %v260_v21 = vadd.f32 %v505_v1, %v237_v12  ;;  %v261_v22 = vadd.f32 %v505_v1, %v238_v13  ;;  %v240_v23 = vmul.f32 %v495_v0, %v217_v15  ;;  %v222_v32 = vld [vmem:[%s500_s21 + $0x60] sm:$0xff]  ;;  %v223_v33 = vld [vmem:[%s500_s21 + $0x68] sm:$0xff]  ;;  %v224_v38 = vld [vmem:[%s500_s21 + $0x70] sm:$0xff] }
  0x14   : > { %v272_v27 = vmax.f32 %v256_v16, 0.0  ;;  %v273_v28 = vmax.f32 %v257_v17, 0.0  ;;  %v274_v29 = vmax.f32 %v258_v18, 0.0  ;;  %v262_v30 = vadd.f32 %v505_v1, %v239_v19  ;;  %v225_v43 = vld [vmem:[%s500_s21 + $0x78] sm:$0xff] }
  0x15   : > { %v275_v34 = vmax.f32 %v259_v20, 0.0  ;;  %v276_v35 = vmax.f32 %v260_v21, 0.0  ;;  %v277_v36 = vmax.f32 %v261_v22, 0.0  ;;  %v263_v37 = vadd.f32 %v505_v1, %v240_v23 }
  0x16   : > { %288 = vst [vmem:[%s528_s26] sm:$0xff] %v272_v27  ;;  %289 = vst [vmem:[%s528_s26 + $0x8] sm:$0xff] %v273_v28  ;;  %v278_v39 = vmax.f32 %v262_v30, 0.0  ;;  %v241_v40 = vmul.f32 %v495_v0, %v218_v24  ;;  %v242_v41 = vmul.f32 %v495_v0, %v219_v25  ;;  %v243_v42 = vmul.f32 %v495_v0, %v220_v26 }
  0x17   : > { %290 = vst [vmem:[%s528_s26 + $0x10] sm:$0xff] %v274_v29  ;;  %291 = vst [vmem:[%s528_s26 + $0x18] sm:$0xff] %v275_v34  ;;  %v279_v44 = vmax.f32 %v263_v37, 0.0  ;;  %v244_v45 = vmul.f32 %v495_v0, %v221_v31  ;;  %v245_v46 = vmul.f32 %v495_v0, %v222_v32  ;;  %v246_v47 = vmul.f32 %v495_v0, %v223_v33 }
  0x18   : > { %292 = vst [vmem:[%s528_s26 + $0x20] sm:$0xff] %v276_v35  ;;  %293 = vst [vmem:[%s528_s26 + $0x28] sm:$0xff] %v277_v36  ;;  %v264_v48 = vadd.f32 %v505_v1, %v241_v40  ;;  %v265_v49 = vadd.f32 %v505_v1, %v242_v41  ;;  %v266_v50 = vadd.f32 %v505_v1, %v243_v42 }
  0x19   : > { %294 = vst [vmem:[%s528_s26 + $0x30] sm:$0xff] %v278_v39  ;;  %v247_v51 = vmul.f32 %v495_v0, %v224_v38  ;;  %295 = vst [vmem:[%s528_s26 + $0x38] sm:$0xff] %v279_v44  ;;  %v267_v52 = vadd.f32 %v505_v1, %v244_v45  ;;  %v268_v53 = vadd.f32 %v505_v1, %v245_v46 }
  0x1a   : > { %v269_v54 = vadd.f32 %v505_v1, %v246_v47  ;;  %v248_v55 = vmul.f32 %v495_v0, %v225_v43  ;;  %v280_v56 = vmax.f32 %v264_v48, 0.0  ;;  %v281_v57 = vmax.f32 %v265_v49, 0.0 }
  0x1b   : > { %v282_v58 = vmax.f32 %v266_v50, 0.0  ;;  %v270_v59 = vadd.f32 %v505_v1, %v247_v51  ;;  %v283_v60 = vmax.f32 %v267_v52, 0.0  ;;  %v284_v61 = vmax.f32 %v268_v53, 0.0 }
  0x1c   : > { %v285_v62 = vmax.f32 %v269_v54, 0.0  ;;  %v271_v63 = vadd.f32 %v505_v1, %v248_v55  ;;  %296 = vst [vmem:[%s528_s26 + $0x40] sm:$0xff] %v280_v56  ;;  %297 = vst [vmem:[%s528_s26 + $0x48] sm:$0xff] %v281_v57 }
  0x1d   : > { %298 = vst [vmem:[%s528_s26 + $0x50] sm:$0xff] %v282_v58  ;;  %v286_v2 = vmax.f32 %v270_v59, 0.0  ;;  %299 = vst [vmem:[%s528_s26 + $0x58] sm:$0xff] %v283_v60 }
  0x1e   : > { %300 = vst [vmem:[%s528_s26 + $0x60] sm:$0xff] %v284_v61  ;;  %301 = vst [vmem:[%s528_s26 + $0x68] sm:$0xff] %v285_v62  ;;  %v287_v0 = vmax.f32 %v271_v63, 0.0 }
  0x1f   : > { %302 = vst [vmem:[%s528_s26 + $0x70] sm:$0xff] %v286_v2 }
  0x20   : > { %303 = vst [vmem:[%s528_s26 + $0x78] sm:$0xff] %v287_v0 }
  0x21 PF: > { %s13_s14 = sadd.s32 1, %s452_s14   ;;  %s589_s12 = smov %s448_s13 }
  0x22   : > { %p10_p5 = scmp.ge.s32.totalorder %s13_s14, 6   ;;  %s590_s13 = smov %s592_s15 }
  0x24   :  { %12 = sbr.rel (!%p10_p5) target bundleno = 2 (0x2), region = 62 }

// kernel: netG_forward.15
= control target key start
LH: loop header
LB: loop body
LE: loop exit
PB: predicated region body
PF: predicated region fallthrough
CT: control target
= control target key end

     0   :  { %s946_s15 = smov 0   ;;  %s948_s16 = smov 0   ;;  %s1032_s0 = inlined_call_operand.vmem [shape: bf16[4,128,128], index: 0, kind: input, shape index: {}]   ;;  %s1033_s1 = inlined_call_operand.vmem [shape: bf16[4,128,128], index: 1, kind: input, shape index: {}]   ;;  %s1034_s2 = inlined_call_operand.vmem [shape: f32[4,128,128], index: 2, kind: output, shape index: {0}]   ;;  %s1035_s3 = inlined_call_operand.vmem [shape: f32[4,1,1,128], index: 3, kind: output, shape index: {1}]   ;;  %s1036_s4 = inlined_call_operand.vmem [shape: f32[4,1,1,128], index: 4, kind: output, shape index: {2}]  }
   0x1   :  { %s950_s17 = smov 0  }
   0x2 LB: > { %s27_s18 = sadd.s32 1, %s915_s16  ;;  %p765_p0 = scmp.ge.s32.totalorder %s919_s17, 1  ;;  %s919_s17 = sphi %s950_s17, %s15_s17   ;;  %s915_s16 = sphi %s948_s16, %s1038_s16   ;;  %s911_s15 = sphi %s946_s15, %s1037_s15  }
   0x3   : > { %p29_p1 = scmp.ge.s32.totalorder %s27_s18, 4  ;;  %p202_p2 = scmp.lt.s32.totalorder %s919_s17, 5 }
   0x5   : > { %s1040_s18 = smov (%p29_p1, %s27_s18), 0  ;;  %p203_p3 = pnand %p765_p0, %p202_p2 }
   0x6   : > { %p254_p4 = scmp.lt.s32.totalorder (!%p203_p3), %s911_s15, 3 }
   0x7   : > { %206 = sbr.rel (%p203_p3) target bundleno = 292 (0x124), region = 28 }
   0xc   : > { %s1042_s15 = smov (!%p254_p4, %s911_s15), 3 }
   0xd   : > { %s790_s19 = sshll.u32 %s1042_s15, 6  ;;  %s792_s26 = sshll.u32 %s1042_s15, 7 }
   0xe   : > { %s970_s22 = scalar_lea.vmem %s1033_s1, %s790_s19  ;;  %s978_s25 = scalar_lea.vmem %s1032_s0, %s790_s19 }
   0xf   : > { %v881_v0 = vld [vmem:[%s970_s22 + $0x38] sm:$0xff]   ;;  %v882_v1 = vld [vmem:[%s970_s22 + $0x30] sm:$0xff]   ;;  %v883_v2 = vld [vmem:[%s970_s22 + $0x28] sm:$0xff]   ;;  %s997_s29 = scalar_lea.vmem %s1034_s2, %s792_s26  ;;  %s283_s6 = scalar_lea.vmem %s1035_s3, %s1042_s15 }
  0x10   : > { %809 = vmatprep.subr.bf16.mxu0 %v881_v0  ;;  %841 = vmatprep.subr.bf16.mxu1 %v881_v0  ;;  %v884_v3 = vld [vmem:[%s970_s22 + $0x20] sm:$0xff]   ;;  %v885_v5 = vld [vmem:[%s970_s22 + $0x18] sm:$0xff]   ;;  %v886_v7 = vld [vmem:[%s970_s22 + $0x10] sm:$0xff]   ;;  %s289_s9 = scalar_lea.vmem %s1036_s4, %s1042_s15 }
  0x11   : > { %810 = vmatpush3.bf16.msra.mxu0 %v881_v0  ;;  %849 = vmatpush3.bf16.msra.mxu1 %v881_v0  ;;  %v889_v4 = vld [vmem:[%s978_s25] sm:$0xff]   ;;  %v887_v8 = vld [vmem:[%s970_s22 + $0x8] sm:$0xff]   ;;  %v891_v12 = vld [vmem:[%s978_s25 + $0x10] sm:$0xff]  }
  0x12   : > { %811 = vmatprep.subr.bf16.mxu0 %v882_v1  ;;  %842 = vmatprep.subr.bf16.mxu1 %v882_v1  ;;  %v893_v6 = vld [vmem:[%s978_s25 + $0x20] sm:$0xff]   ;;  %v890_v10 = vld [vmem:[%s978_s25 + $0x8] sm:$0xff]   ;;  %v895_v13 = vld [vmem:[%s978_s25 + $0x30] sm:$0xff]  }
  0x13   : > { %825 = vmatprep.mubr.bf16.mxu0 %v889_v4  ;;  %833 = vmatprep.mubr.bf16.mxu1 %v893_v6  ;;  %v888_v9 = vld [vmem:[%s970_s22] sm:$0xff]   ;;  %v894_v11 = vld [vmem:[%s978_s25 + $0x28] sm:$0xff]   ;;  %v892_v14 = vld [vmem:[%s978_s25 + $0x18] sm:$0xff]  }
  0x14   : > { %v896_v15 = vld [vmem:[%s978_s25 + $0x38] sm:$0xff]  }
  0x15   : > { %812 = vmatpush3.bf16.msra.mxu0 %v882_v1  ;;  %850 = vmatpush3.bf16.msra.mxu1 %v882_v1 }
  0x16   : > { %813 = vmatprep.subr.bf16.mxu0 %v883_v2  ;;  %843 = vmatprep.subr.bf16.mxu1 %v883_v2 }
  0x19   : > { %814 = vmatpush3.bf16.msra.mxu0 %v883_v2  ;;  %851 = vmatpush3.bf16.msra.mxu1 %v883_v2 }
  0x1a   : > { %815 = vmatprep.subr.bf16.mxu0 %v884_v3  ;;  %844 = vmatprep.subr.bf16.mxu1 %v884_v3 }
  0x1d   : > { %816 = vmatpush3.bf16.msra.mxu0 %v884_v3  ;;  %852 = vmatpush3.bf16.msra.mxu1 %v884_v3 }
  0x1e   : > { %817 = vmatprep.subr.bf16.mxu0 %v885_v5  ;;  %845 = vmatprep.subr.bf16.mxu1 %v885_v5 }
  0x21   : > { %818 = vmatpush3.bf16.msra.mxu0 %v885_v5  ;;  %853 = vmatpush3.bf16.msra.mxu1 %v885_v5 }
  0x22   : > { %819 = vmatprep.subr.bf16.mxu0 %v886_v7  ;;  %846 = vmatprep.subr.bf16.mxu1 %v886_v7 }
  0x25   : > { %820 = vmatpush3.bf16.msra.mxu0 %v886_v7  ;;  %854 = vmatpush3.bf16.msra.mxu1 %v886_v7 }
  0x26   : > { %821 = vmatprep.subr.bf16.mxu0 %v887_v8  ;;  %847 = vmatprep.subr.bf16.mxu1 %v887_v8 }
  0x29   : > { %822 = vmatpush3.bf16.msra.mxu0 %v887_v8  ;;  %855 = vmatpush3.bf16.msra.mxu1 %v887_v8 }
  0x2a   : > { %823 = vmatprep.subr.bf16.mxu0 %v888_v9  ;;  %848 = vmatprep.subr.bf16.mxu1 %v888_v9 }
  0x2d   : > { %824 = vmatpush3.bf16.msra.mxu0 %v888_v9  ;;  %856 = vmatpush3.bf16.msra.mxu1 %v888_v9 }
  0x30   : > { %826 = vmatmul.mubr.bf16.vlgmr.msra.gmra.mxu0 %v890_v10  ;;  %834 = vmatmul.mubr.bf16.vlgmr.msra.gmra.mxu1 %v894_v11 }
  0x31   : > { %829 = vmatprep.mubr.bf16.mxu0 %v891_v12  ;;  %837 = vmatprep.mubr.bf16.mxu1 %v895_v13 }
  0x38   : > { %830 = vmatmul.mubr.bf16.gmra.mxu0 %v892_v14  ;;  %838 = vmatmul.mubr.bf16.gmra.mxu1 %v896_v15 }
  0xf0   : > { %v827_v16 = vpop.f32.mrf.mxu0  ;;  %v835_v17 = vpop.f32.mrf.mxu1 }
  0xf1   : > { %518 = vst [vmem:[%s997_s29 + $0x10] sm:$0xff] %v827_v16  ;;  %526 = vst [vmem:[%s997_s29 + $0x50] sm:$0xff] %v835_v17  ;;  %v556_v29 = vmul.f32 %v827_v16, %v827_v16  ;;  %v564_v59 = vmul.f32 %v835_v17, %v835_v17 }
  0xf2   : > { %v453_v18 = vpop.f32.mrf.mxu0  ;;  %v485_v19 = vpop.f32.mrf.mxu1 }
  0xf3   : > { %516 = vst [vmem:[%s997_s29] sm:$0xff] %v453_v18  ;;  %524 = vst [vmem:[%s997_s29 + $0x40] sm:$0xff] %v485_v19  ;;  %v554_v24 = vmul.f32 %v453_v18, %v453_v18  ;;  %v562_v53 = vmul.f32 %v485_v19, %v485_v19 }
  0xf4   : > { %v828_v20 = vpop.f32.mrf.mxu0  ;;  %v836_v21 = vpop.f32.mrf.mxu1 }
  0xf5   : > { %519 = vst [vmem:[%s997_s29 + $0x18] sm:$0xff] %v828_v20  ;;  %527 = vst [vmem:[%s997_s29 + $0x58] sm:$0xff] %v836_v21  ;;  %v557_v34 = vmul.f32 %v828_v20, %v828_v20  ;;  %v565_v62 = vmul.f32 %v836_v21, %v836_v21 }
  0xf6   : > { %v456_v22 = vpop.f32.mrf.mxu0  ;;  %v488_v23 = vpop.f32.mrf.mxu1 }
  0xf7   : > { %517 = vst [vmem:[%s997_s29 + $0x8] sm:$0xff] %v456_v22  ;;  %v532_v25 = vadd.f32 %v456_v22, %v453_v18  ;;  %v555_v26 = vmul.f32 %v456_v22, %v456_v22  ;;  %525 = vst [vmem:[%s997_s29 + $0x48] sm:$0xff] %v488_v23  ;;  %v563_v57 = vmul.f32 %v488_v23, %v488_v23 }
  0xf8   : > { %v831_v27 = vpop.f32.mrf.mxu0  ;;  %v839_v28 = vpop.f32.mrf.mxu1 }
  0xf9   : > { %v533_v30 = vadd.f32 %v827_v16, %v532_v25  ;;  %v570_v31 = vadd.f32 %v555_v26, %v554_v24  ;;  %522 = vst [vmem:[%s997_s29 + $0x30] sm:$0xff] %v831_v27  ;;  %530 = vst [vmem:[%s997_s29 + $0x70] sm:$0xff] %v839_v28  ;;  %v560_v47 = vmul.f32 %v831_v27, %v831_v27 }
  0xfa   : > { %v469_v32 = vpop.f32.mrf.mxu0  ;;  %v501_v33 = vpop.f32.mrf.mxu1  ;;  %v568_v7 = vmul.f32 %v839_v28, %v839_v28 }
  0xfb   : > { %v571_v35 = vadd.f32 %v570_v31, %v556_v29  ;;  %520 = vst [vmem:[%s997_s29 + $0x20] sm:$0xff] %v469_v32  ;;  %v534_v36 = vadd.f32 %v828_v20, %v533_v30  ;;  %528 = vst [vmem:[%s997_s29 + $0x60] sm:$0xff] %v501_v33  ;;  %v558_v40 = vmul.f32 %v469_v32, %v469_v32 }
  0xfc   : > { %v832_v37 = vpop.f32.mrf.mxu0  ;;  %v840_v38 = vpop.f32.mrf.mxu1  ;;  %v566_v2 = vmul.f32 %v501_v33, %v501_v33 }
  0xfd   : > { %v535_v39 = vadd.f32 %v534_v36, %v469_v32  ;;  %v572_v41 = vadd.f32 %v571_v35, %v557_v34  ;;  %523 = vst [vmem:[%s997_s29 + $0x38] sm:$0xff] %v832_v37  ;;  %531 = vst [vmem:[%s997_s29 + $0x78] sm:$0xff] %v840_v38  ;;  %v561_v50 = vmul.f32 %v832_v37, %v832_v37 }
  0xfe   : > { %v472_v42 = vpop.f32.mrf.mxu0  ;;  %v504_v43 = vpop.f32.mrf.mxu1  ;;  %v569_v10 = vmul.f32 %v840_v38, %v840_v38 }
  0xff   : > { %v573_v44 = vadd.f32 %v572_v41, %v558_v40  ;;  %521 = vst [vmem:[%s997_s29 + $0x28] sm:$0xff] %v472_v42  ;;  %v536_v45 = vadd.f32 %v535_v39, %v472_v42  ;;  %v559_v46 = vmul.f32 %v472_v42, %v472_v42  ;;  %529 = vst [vmem:[%s997_s29 + $0x68] sm:$0xff] %v504_v43 }
 0x100   : > { %v567_v6 = vmul.f32 %v504_v43, %v504_v43 }
 0x101   : > { %v537_v48 = vadd.f32 %v831_v27, %v536_v45  ;;  %v574_v49 = vadd.f32 %v573_v44, %v559_v46 }
 0x103   : > { %v538_v51 = vadd.f32 %v832_v37, %v537_v48  ;;  %v575_v52 = vadd.f32 %v574_v49, %v560_v47 }
 0x105   : > { %v576_v54 = vadd.f32 %v575_v52, %v561_v50  ;;  %v539_v55 = vadd.f32 %v538_v51, %v485_v19 }
 0x107   : > { %v540_v56 = vadd.f32 %v539_v55, %v488_v23  ;;  %v577_v58 = vadd.f32 %v576_v54, %v562_v53 }
 0x109   : > { %v541_v60 = vadd.f32 %v835_v17, %v540_v56  ;;  %v578_v61 = vadd.f32 %v577_v58, %v563_v57 }
 0x10b   : > { %v579_v63 = vadd.f32 %v578_v61, %v564_v59  ;;  %v542_v0 = vadd.f32 %v836_v21, %v541_v60 }
 0x10d   : > { %v543_v1 = vadd.f32 %v542_v0, %v501_v33  ;;  %v580_v3 = vadd.f32 %v579_v63, %v565_v62 }
 0x10f   : > { %v581_v4 = vadd.f32 %v580_v3, %v566_v2  ;;  %v544_v5 = vadd.f32 %v543_v1, %v504_v43 }
 0x111   : > { %v545_v8 = vadd.f32 %v839_v28, %v544_v5  ;;  %v582_v9 = vadd.f32 %v581_v4, %v567_v6 }
 0x113   : > { %v546_v11 = vadd.f32 %v840_v38, %v545_v8  ;;  %v583_v12 = vadd.f32 %v582_v9, %v568_v7 }
 0x115   : > { %v547_v13 = vrot.slane %v546_v11, 4  ;;  %v584_v14 = vadd.f32 %v583_v12, %v569_v10 }
 0x117   : > { %v548_v15 = vadd.f32 %v547_v13, %v546_v11  ;;  %v585_v16 = vrot.slane %v584_v14, 4 }
 0x119   : > { %v549_v17 = vrot.slane %v548_v15, 2  ;;  %v586_v18 = vadd.f32 %v585_v16, %v584_v14 }
 0x11b   : > { %v550_v19 = vadd.f32 %v549_v17, %v548_v15  ;;  %v587_v20 = vrot.slane %v586_v18, 2 }
 0x11d   : > { %v551_v21 = vrot.slane %v550_v19, 1  ;;  %v588_v22 = vadd.f32 %v587_v20, %v586_v18 }
 0x11f   : > { %v552_v23 = vadd.f32 %v551_v21, %v550_v19  ;;  %v589_v24 = vrot.slane %v588_v22, 1 }
 0x121   : > { %553 = vst [vmem:[%s283_s6] sm:$0x1] %v552_v23  ;;  %v590_v25 = vadd.f32 %v589_v24, %v588_v22 }
 0x123   : > { %591 = vst [vmem:[%s289_s9] sm:$0x1] %v590_v25 }
 0x124 PF: > { %s15_s17 = sadd.s32 1, %s919_s17   ;;  %s1037_s15 = smov %s915_s16 }
 0x125   : > { %p12_p5 = scmp.ge.s32.totalorder %s15_s17, 6   ;;  %s1038_s16 = smov %s1040_s18 }
 0x127   :  { %14 = sbr.rel (!%p12_p5) target bundleno = 2 (0x2), region = 85 }

// kernel: netG_forward.18
= control target key start
LH: loop header
LB: loop body
LE: loop exit
PB: predicated region body
PF: predicated region fallthrough
CT: control target
= control target key end

     0   :  { %s552_s12 = smov 0   ;;  %s554_s13 = smov 0   ;;  %s727_s0 = inlined_call_operand.vmem [shape: f32[1,512,128], index: 0, kind: input, shape index: {}]   ;;  %s728_s1 = inlined_call_operand.vmem [shape: f32[1,128], index: 1, kind: input, shape index: {}]   ;;  %s729_s2 = inlined_call_operand.vmem [shape: f32[1,128], index: 2, kind: input, shape index: {}]   ;;  %s730_s3 = inlined_call_operand.vmem [shape: f32[1,512,128], index: 3, kind: output, shape index: {}]  }
   0x1   :  { %s556_s14 = smov 0  }
   0x2 LB: > { %s22_s15 = sadd.s32 1, %s526_s13  ;;  %p475_p0 = scmp.ge.s32.totalorder %s530_s14, 1  ;;  %s530_s14 = sphi %s556_s14, %s13_s14   ;;  %s526_s13 = sphi %s554_s13, %s732_s13   ;;  %s522_s12 = sphi %s552_s12, %s731_s12  }
   0x3   : > { %p23_p1 = scmp.ge.s32.totalorder %s22_s15, 2  ;;  %p158_p2 = scmp.lt.s32.totalorder %s530_s14, 3 }
   0x5   : > { %s734_s15 = smov (%p23_p1, %s22_s15), 0  ;;  %p159_p3 = pnand %p475_p0, %p158_p2 }
   0x6   : > { %s476_s16 = sshll.u32 (!%p159_p3), %s522_s12, 5 }
   0x7   : > { %162 = sbr.rel (%p159_p3) target bundleno = 45 (0x2d), region = 32  ;;  %p193_p4 = scmp.lt.s32.totalorder (!%p159_p3), %s476_s16, 63 }
   0xc   : > { %s736_s16 = smov (!%p193_p4, %s476_s16), 63  ;;  %v573_v0 = vld [vmem:[%s728_s1] ss:$0 sm:$0xff] }
   0xd   : > { %s477_s17 = sshll.u32 %s736_s16, 3  ;;  %v583_v1 = vld [vmem:[%s729_s2] ss:$0 sm:$0xff] }
   0xe   : > { %s578_s22 = scalar_lea.vmem %s727_s0, %s477_s17  ;;  %s606_s27 = scalar_lea.vmem %s730_s3, %s477_s17 }
   0xf   : > { %v210_v2 = vld [vmem:[%s578_s22] sm:$0xff]  ;;  %v211_v3 = vld [vmem:[%s578_s22 + $0x8] sm:$0xff]  ;;  %v212_v4 = vld [vmem:[%s578_s22 + $0x10] sm:$0xff] }
  0x10   : > { %v249_v5 = vmul.f32 %v573_v0, %v210_v2  ;;  %v250_v6 = vmul.f32 %v573_v0, %v211_v3  ;;  %v251_v7 = vmul.f32 %v573_v0, %v212_v4  ;;  %v213_v8 = vld [vmem:[%s578_s22 + $0x18] sm:$0xff]  ;;  %v214_v9 = vld [vmem:[%s578_s22 + $0x20] sm:$0xff]  ;;  %v215_v10 = vld [vmem:[%s578_s22 + $0x28] sm:$0xff] }
  0x11   : > { %v252_v11 = vmul.f32 %v573_v0, %v213_v8  ;;  %v253_v12 = vmul.f32 %v573_v0, %v214_v9  ;;  %v254_v13 = vmul.f32 %v573_v0, %v215_v10  ;;  %v216_v14 = vld [vmem:[%s578_s22 + $0x30] sm:$0xff]  ;;  %v217_v15 = vld [vmem:[%s578_s22 + $0x38] sm:$0xff]  ;;  %v218_v24 = vld [vmem:[%s578_s22 + $0x40] sm:$0xff] }
  0x12   : > { %v288_v16 = vadd.f32 %v583_v1, %v249_v5  ;;  %v289_v17 = vadd.f32 %v583_v1, %v250_v6  ;;  %v290_v18 = vadd.f32 %v583_v1, %v251_v7  ;;  %v255_v19 = vmul.f32 %v573_v0, %v216_v14  ;;  %v219_v25 = vld [vmem:[%s578_s22 + $0x48] sm:$0xff]  ;;  %v220_v26 = vld [vmem:[%s578_s22 + $0x50] sm:$0xff]  ;;  %v221_v31 = vld [vmem:[%s578_s22 + $0x58] sm:$0xff] }
  0x13   : > { %v291_v20 = vadd.f32 %v583_v1, %v252_v11  ;;  %v292_v21 = vadd.f32 %v583_v1, %v253_v12  ;;  %v293_v22 = vadd.f32 %v583_v1, %v254_v13  ;;  %v256_v23 = vmul.f32 %v573_v0, %v217_v15  ;;  %v222_v32 = vld [vmem:[%s578_s22 + $0x60] sm:$0xff]  ;;  %v223_v33 = vld [vmem:[%s578_s22 + $0x68] sm:$0xff]  ;;  %v224_v38 = vld [vmem:[%s578_s22 + $0x70] sm:$0xff] }
  0x14   : > { %v320_v27 = vmax.f32 %v288_v16, 0.0  ;;  %v321_v28 = vmax.f32 %v289_v17, 0.0  ;;  %v322_v29 = vmax.f32 %v290_v18, 0.0  ;;  %v294_v30 = vadd.f32 %v583_v1, %v255_v19  ;;  %v225_v43 = vld [vmem:[%s578_s22 + $0x78] sm:$0xff]  ;;  %v226_v56 = vld [vmem:[%s578_s22 + $0x80] sm:$0xff]  ;;  %v227_v57 = vld [vmem:[%s578_s22 + $0x88] sm:$0xff] }
  0x15   : > { %v323_v34 = vmax.f32 %v291_v20, 0.0  ;;  %v324_v35 = vmax.f32 %v292_v21, 0.0  ;;  %v325_v36 = vmax.f32 %v293_v22, 0.0  ;;  %v295_v37 = vadd.f32 %v583_v1, %v256_v23  ;;  %v228_v58 = vld [vmem:[%s578_s22 + $0x90] sm:$0xff]  ;;  %v229_v63 = vld [vmem:[%s578_s22 + $0x98] sm:$0xff]  ;;  %v230_v2 = vld [vmem:[%s578_s22 + $0xa0] sm:$0xff] }
  0x16   : > { %352 = vst [vmem:[%s606_s27] sm:$0xff] %v320_v27  ;;  %353 = vst [vmem:[%s606_s27 + $0x8] sm:$0xff] %v321_v28  ;;  %v326_v39 = vmax.f32 %v294_v30, 0.0  ;;  %v257_v40 = vmul.f32 %v573_v0, %v218_v24  ;;  %v258_v41 = vmul.f32 %v573_v0, %v219_v25  ;;  %v259_v42 = vmul.f32 %v573_v0, %v220_v26  ;;  %v231_v3 = vld [vmem:[%s578_s22 + $0xa8] sm:$0xff]  ;;  %v232_v8 = vld [vmem:[%s578_s22 + $0xb0] sm:$0xff] }
  0x17   : > { %354 = vst [vmem:[%s606_s27 + $0x10] sm:$0xff] %v322_v29  ;;  %355 = vst [vmem:[%s606_s27 + $0x18] sm:$0xff] %v323_v34  ;;  %v327_v44 = vmax.f32 %v295_v37, 0.0  ;;  %v260_v45 = vmul.f32 %v573_v0, %v221_v31  ;;  %v261_v46 = vmul.f32 %v573_v0, %v222_v32  ;;  %v262_v47 = vmul.f32 %v573_v0, %v223_v33  ;;  %v233_v13 = vld [vmem:[%s578_s22 + $0xb8] sm:$0xff]  ;;  %v234_v26 = vld [vmem:[%s578_s22 + $0xc0] sm:$0xff] }
  0x18   : > { %356 = vst [vmem:[%s606_s27 + $0x20] sm:$0xff] %v324_v35  ;;  %357 = vst [vmem:[%s606_s27 + $0x28] sm:$0xff] %v325_v36  ;;  %v296_v48 = vadd.f32 %v583_v1, %v257_v40  ;;  %v297_v49 = vadd.f32 %v583_v1, %v258_v41  ;;  %v298_v50 = vadd.f32 %v583_v1, %v259_v42  ;;  %v235_v27 = vld [vmem:[%s578_s22 + $0xc8] sm:$0xff]  ;;  %v236_v28 = vld [vmem:[%s578_s22 + $0xd0] sm:$0xff] }
  0x19   : > { %358 = vst [vmem:[%s606_s27 + $0x30] sm:$0xff] %v326_v39  ;;  %v263_v51 = vmul.f32 %v573_v0, %v224_v38  ;;  %359 = vst [vmem:[%s606_s27 + $0x38] sm:$0xff] %v327_v44  ;;  %v299_v52 = vadd.f32 %v583_v1, %v260_v45  ;;  %v300_v53 = vadd.f32 %v583_v1, %v261_v46  ;;  %v237_v33 = vld [vmem:[%s578_s22 + $0xd8] sm:$0xff]  ;;  %v238_v34 = vld [vmem:[%s578_s22 + $0xe0] sm:$0xff] }
  0x1a   : > { %v301_v54 = vadd.f32 %v583_v1, %v262_v47  ;;  %v264_v55 = vmul.f32 %v573_v0, %v225_v43  ;;  %v328_v59 = vmax.f32 %v296_v48, 0.0  ;;  %v329_v60 = vmax.f32 %v297_v49, 0.0  ;;  %v239_v35 = vld [vmem:[%s578_s22 + $0xe8] sm:$0xff]  ;;  %v240_v40 = vld [vmem:[%s578_s22 + $0xf0] sm:$0xff]  ;;  %v241_v45 = vld [vmem:[%s578_s22 + $0xf8] sm:$0xff] }
  0x1b   : > { %v330_v61 = vmax.f32 %v298_v50, 0.0  ;;  %v302_v62 = vadd.f32 %v583_v1, %v263_v51  ;;  %v331_v4 = vmax.f32 %v299_v52, 0.0  ;;  %v332_v5 = vmax.f32 %v300_v53, 0.0 }
  0x1c   : > { %v333_v6 = vmax.f32 %v301_v54, 0.0  ;;  %v303_v7 = vadd.f32 %v583_v1, %v264_v55  ;;  %360 = vst [vmem:[%s606_s27 + $0x40] sm:$0xff] %v328_v59  ;;  %361 = vst [vmem:[%s606_s27 + $0x48] sm:$0xff] %v329_v60  ;;  %v265_v10 = vmul.f32 %v573_v0, %v226_v56  ;;  %v266_v11 = vmul.f32 %v573_v0, %v227_v57 }
  0x1d   : > { %362 = vst [vmem:[%s606_s27 + $0x50] sm:$0xff] %v330_v61  ;;  %v334_v9 = vmax.f32 %v302_v62, 0.0  ;;  %v267_v12 = vmul.f32 %v573_v0, %v228_v58  ;;  %363 = vst [vmem:[%s606_s27 + $0x58] sm:$0xff] %v331_v4  ;;  %v268_v15 = vmul.f32 %v573_v0, %v229_v63  ;;  %v269_v16 = vmul.f32 %v573_v0, %v230_v2 }
  0x1e   : > { %364 = vst [vmem:[%s606_s27 + $0x60] sm:$0xff] %v332_v5  ;;  %365 = vst [vmem:[%s606_s27 + $0x68] sm:$0xff] %v333_v6  ;;  %v335_v14 = vmax.f32 %v303_v7, 0.0  ;;  %v270_v17 = vmul.f32 %v573_v0, %v231_v3  ;;  %v304_v18 = vadd.f32 %v583_v1, %v265_v10  ;;  %v305_v19 = vadd.f32 %v583_v1, %v266_v11 }
  0x1f   : > { %366 = vst [vmem:[%s606_s27 + $0x70] sm:$0xff] %v334_v9  ;;  %v306_v20 = vadd.f32 %v583_v1, %v267_v12  ;;  %v271_v21 = vmul.f32 %v573_v0, %v232_v8  ;;  %v307_v22 = vadd.f32 %v583_v1, %v268_v15  ;;  %v308_v23 = vadd.f32 %v583_v1, %v269_v16 }
  0x20   : > { %367 = vst [vmem:[%s606_s27 + $0x78] sm:$0xff] %v335_v14  ;;  %v309_v24 = vadd.f32 %v583_v1, %v270_v17  ;;  %v272_v25 = vmul.f32 %v573_v0, %v233_v13  ;;  %v336_v29 = vmax.f32 %v304_v18, 0.0  ;;  %v337_v30 = vmax.f32 %v305_v19, 0.0 }
  0x21   : > { %v338_v31 = vmax.f32 %v306_v20, 0.0  ;;  %v310_v32 = vadd.f32 %v583_v1, %v271_v21  ;;  %v339_v36 = vmax.f32 %v307_v22, 0.0  ;;  %v340_v37 = vmax.f32 %v308_v23, 0.0 }
  0x22   : > { %v341_v38 = vmax.f32 %v309_v24, 0.0  ;;  %v311_v39 = vadd.f32 %v583_v1, %v272_v25  ;;  %368 = vst [vmem:[%s606_s27 + $0x80] sm:$0xff] %v336_v29  ;;  %369 = vst [vmem:[%s606_s27 + $0x88] sm:$0xff] %v337_v30  ;;  %v273_v42 = vmul.f32 %v573_v0, %v234_v26  ;;  %v274_v43 = vmul.f32 %v573_v0, %v235_v27 }
  0x23   : > { %370 = vst [vmem:[%s606_s27 + $0x90] sm:$0xff] %v338_v31  ;;  %v342_v41 = vmax.f32 %v310_v32, 0.0  ;;  %v275_v44 = vmul.f32 %v573_v0, %v236_v28  ;;  %371 = vst [vmem:[%s606_s27 + $0x98] sm:$0xff] %v339_v36  ;;  %v276_v47 = vmul.f32 %v573_v0, %v237_v33  ;;  %v277_v48 = vmul.f32 %v573_v0, %v238_v34 }
  0x24   : > { %372 = vst [vmem:[%s606_s27 + $0xa0] sm:$0xff] %v340_v37  ;;  %373 = vst [vmem:[%s606_s27 + $0xa8] sm:$0xff] %v341_v38  ;;  %v343_v46 = vmax.f32 %v311_v39, 0.0  ;;  %v278_v49 = vmul.f32 %v573_v0, %v239_v35  ;;  %v312_v50 = vadd.f32 %v583_v1, %v273_v42  ;;  %v313_v51 = vadd.f32 %v583_v1, %v274_v43 }
  0x25   : > { %374 = vst [vmem:[%s606_s27 + $0xb0] sm:$0xff] %v342_v41  ;;  %v314_v52 = vadd.f32 %v583_v1, %v275_v44  ;;  %v279_v53 = vmul.f32 %v573_v0, %v240_v40  ;;  %v315_v54 = vadd.f32 %v583_v1, %v276_v47  ;;  %v316_v55 = vadd.f32 %v583_v1, %v277_v48 }
  0x26   : > { %375 = vst [vmem:[%s606_s27 + $0xb8] sm:$0xff] %v343_v46  ;;  %v317_v56 = vadd.f32 %v583_v1, %v278_v49  ;;  %v280_v57 = vmul.f32 %v573_v0, %v241_v45  ;;  %v344_v58 = vmax.f32 %v312_v50, 0.0  ;;  %v345_v59 = vmax.f32 %v313_v51, 0.0 }
  0x27   : > { %v346_v60 = vmax.f32 %v314_v52, 0.0  ;;  %v318_v61 = vadd.f32 %v583_v1, %v279_v53  ;;  %v347_v62 = vmax.f32 %v315_v54, 0.0  ;;  %v348_v63 = vmax.f32 %v316_v55, 0.0 }
  0x28   : > { %v349_v2 = vmax.f32 %v317_v56, 0.0  ;;  %v319_v3 = vadd.f32 %v583_v1, %v280_v57  ;;  %376 = vst [vmem:[%s606_s27 + $0xc0] sm:$0xff] %v344_v58  ;;  %377 = vst [vmem:[%s606_s27 + $0xc8] sm:$0xff] %v345_v59 }
  0x29   : > { %378 = vst [vmem:[%s606_s27 + $0xd0] sm:$0xff] %v346_v60  ;;  %v350_v4 = vmax.f32 %v318_v61, 0.0  ;;  %379 = vst [vmem:[%s606_s27 + $0xd8] sm:$0xff] %v347_v62 }
  0x2a   : > { %380 = vst [vmem:[%s606_s27 + $0xe0] sm:$0xff] %v348_v63  ;;  %381 = vst [vmem:[%s606_s27 + $0xe8] sm:$0xff] %v349_v2  ;;  %v351_v0 = vmax.f32 %v319_v3, 0.0 }
  0x2b   : > { %382 = vst [vmem:[%s606_s27 + $0xf0] sm:$0xff] %v350_v4 }
  0x2c   : > { %383 = vst [vmem:[%s606_s27 + $0xf8] sm:$0xff] %v351_v0 }
  0x2d PF: > { %s13_s14 = sadd.s32 1, %s530_s14   ;;  %s731_s12 = smov %s526_s13 }
  0x2e   : > { %p10_p5 = scmp.ge.s32.totalorder %s13_s14, 4   ;;  %s732_s13 = smov %s734_s15 }
  0x30   :  { %12 = sbr.rel (!%p10_p5) target bundleno = 2 (0x2), region = 62 }

// kernel: netG_forward.17
= control target key start
LH: loop header
LB: loop body
LE: loop exit
PB: predicated region body
PF: predicated region fallthrough
CT: control target
= control target key end

     0   :  { %s1193_s15 = smov 0   ;;  %s1195_s16 = smov 0   ;;  %s1401_s0 = inlined_call_operand.vmem [shape: bf16[1,512,128], index: 0, kind: input, shape index: {}]   ;;  %s1402_s1 = inlined_call_operand.vmem [shape: bf16[1,128,128], index: 1, kind: input, shape index: {}]   ;;  %s1403_s2 = inlined_call_operand.vmem [shape: f32[1,512,128], index: 2, kind: output, shape index: {0}]   ;;  %s1404_s3 = inlined_call_operand.vmem [shape: f32[1,2,1,128], index: 3, kind: output, shape index: {1}]   ;;  %s1405_s4 = inlined_call_operand.vmem [shape: f32[1,2,1,128], index: 4, kind: output, shape index: {2}]  }
   0x1   :  { %s1197_s17 = smov 0  }
   0x2 LB: > { %s24_s18 = sadd.s32 1, %s1162_s16  ;;  %p977_p0 = scmp.ge.s32.totalorder %s1166_s17, 1  ;;  %s1166_s17 = sphi %s1197_s17, %s15_s17   ;;  %s1162_s16 = sphi %s1195_s16, %s1407_s16   ;;  %s1158_s15 = sphi %s1193_s15, %s1406_s15  }
   0x3   : > { %p25_p1 = scmp.ge.s32.totalorder %s24_s18, 2  ;;  %p202_p2 = scmp.lt.s32.totalorder %s1166_s17, 3 }
   0x5   : > { %s1409_s18 = smov (%p25_p1, %s24_s18), 0  ;;  %p203_p3 = pnand %p977_p0, %p202_p2 }
   0x6   : > { %s978_s21 = sshll.u32 (!%p203_p3), %s1158_s15, 5  ;;  %p282_p5 = scmp.lt.s32.totalorder (!%p203_p3), %s1158_s15, 1 }
   0x7   : > { %206 = sbr.rel (%p203_p3) target bundleno = 321 (0x141), region = 28  ;;  %p258_p4 = scmp.lt.s32.totalorder (!%p203_p3), %s978_s21, 63 }
   0xc   : > { %v1120_v0 = vld [vmem:[%s1402_s1 + $0x38] sm:$0xff]   ;;  %v1121_v1 = vld [vmem:[%s1402_s1 + $0x30] sm:$0xff]   ;;  %s1411_s21 = smov (!%p258_p4, %s978_s21), 63  ;;  %v1122_v2 = vld [vmem:[%s1402_s1 + $0x28] sm:$0xff]   ;;  %s1413_s15 = smov (!%p282_p5, %s1158_s15), 1 }
   0xd   : > { %1032 = vmatprep.subr.bf16.mxu0 %v1120_v0  ;;  %1080 = vmatprep.subr.bf16.mxu1 %v1120_v0  ;;  %s979_s26 = sshll.u32 %s1411_s21, 2  ;;  %v1123_v3 = vld [vmem:[%s1402_s1 + $0x20] sm:$0xff]   ;;  %v1124_v5 = vld [vmem:[%s1402_s1 + $0x18] sm:$0xff]   ;;  %v1125_v6 = vld [vmem:[%s1402_s1 + $0x10] sm:$0xff]   ;;  %s981_s14 = sshll.u32 %s1411_s21, 3 }
   0xe   : > { %1033 = vmatpush3.bf16.msra.mxu0 %v1120_v0  ;;  %1088 = vmatpush3.bf16.msra.mxu1 %v1120_v0  ;;  %s1229_s29 = scalar_lea.vmem %s1401_s0, %s979_s26  ;;  %v1126_v8 = vld [vmem:[%s1402_s1 + $0x8] sm:$0xff]   ;;  %v1127_v9 = vld [vmem:[%s1402_s1] sm:$0xff]   ;;  %s1266_s22 = scalar_lea.vmem %s1403_s2, %s981_s14 }
   0xf   : > { %1034 = vmatprep.subr.bf16.mxu0 %v1121_v1  ;;  %1081 = vmatprep.subr.bf16.mxu1 %v1121_v1  ;;  %v1128_v4 = vld [vmem:[%s1229_s29] sm:$0xff]   ;;  %v1129_v10 = vld [vmem:[%s1229_s29 + $0x8] sm:$0xff]   ;;  %v1130_v12 = vld [vmem:[%s1229_s29 + $0x10] sm:$0xff]   ;;  %s286_s24 = scalar_lea.vmem %s1404_s3, %s1413_s15  ;;  %s293_s27 = scalar_lea.vmem %s1405_s4, %s1413_s15 }
  0x10   : > { %1048 = vmatprep.mubr.bf16.mxu0 %v1128_v4  ;;  %v1136_v7 = vld [vmem:[%s1229_s29 + $0x40] sm:$0xff]   ;;  %v1137_v11 = vld [vmem:[%s1229_s29 + $0x48] sm:$0xff]   ;;  %v1138_v13 = vld [vmem:[%s1229_s29 + $0x50] sm:$0xff]  }
  0x11   : > { %1064 = vmatprep.mubr.bf16.mxu1 %v1136_v7  ;;  %v1131_v14 = vld [vmem:[%s1229_s29 + $0x18] sm:$0xff]   ;;  %v1132_v16 = vld [vmem:[%s1229_s29 + $0x20] sm:$0xff]   ;;  %v1133_v18 = vld [vmem:[%s1229_s29 + $0x28] sm:$0xff]  }
  0x12   : > { %1035 = vmatpush3.bf16.msra.mxu0 %v1121_v1  ;;  %1089 = vmatpush3.bf16.msra.mxu1 %v1121_v1  ;;  %v1139_v15 = vld [vmem:[%s1229_s29 + $0x58] sm:$0xff]   ;;  %v1140_v17 = vld [vmem:[%s1229_s29 + $0x60] sm:$0xff]   ;;  %v1141_v19 = vld [vmem:[%s1229_s29 + $0x68] sm:$0xff]  }
  0x13   : > { %1036 = vmatprep.subr.bf16.mxu0 %v1122_v2  ;;  %1082 = vmatprep.subr.bf16.mxu1 %v1122_v2  ;;  %v1134_v20 = vld [vmem:[%s1229_s29 + $0x30] sm:$0xff]   ;;  %v1135_v22 = vld [vmem:[%s1229_s29 + $0x38] sm:$0xff]  }
  0x14   : > { %v1142_v21 = vld [vmem:[%s1229_s29 + $0x70] sm:$0xff]   ;;  %v1143_v23 = vld [vmem:[%s1229_s29 + $0x78] sm:$0xff]  }
  0x16   : > { %1037 = vmatpush3.bf16.msra.mxu0 %v1122_v2  ;;  %1090 = vmatpush3.bf16.msra.mxu1 %v1122_v2 }
  0x17   : > { %1038 = vmatprep.subr.bf16.mxu0 %v1123_v3  ;;  %1083 = vmatprep.subr.bf16.mxu1 %v1123_v3 }
  0x1a   : > { %1039 = vmatpush3.bf16.msra.mxu0 %v1123_v3  ;;  %1091 = vmatpush3.bf16.msra.mxu1 %v1123_v3 }
  0x1b   : > { %1040 = vmatprep.subr.bf16.mxu0 %v1124_v5  ;;  %1084 = vmatprep.subr.bf16.mxu1 %v1124_v5 }
  0x1e   : > { %1041 = vmatpush3.bf16.msra.mxu0 %v1124_v5  ;;  %1092 = vmatpush3.bf16.msra.mxu1 %v1124_v5 }
  0x1f   : > { %1042 = vmatprep.subr.bf16.mxu0 %v1125_v6  ;;  %1085 = vmatprep.subr.bf16.mxu1 %v1125_v6 }
  0x22   : > { %1043 = vmatpush3.bf16.msra.mxu0 %v1125_v6  ;;  %1093 = vmatpush3.bf16.msra.mxu1 %v1125_v6 }
  0x23   : > { %1044 = vmatprep.subr.bf16.mxu0 %v1126_v8  ;;  %1086 = vmatprep.subr.bf16.mxu1 %v1126_v8 }
  0x26   : > { %1045 = vmatpush3.bf16.msra.mxu0 %v1126_v8  ;;  %1094 = vmatpush3.bf16.msra.mxu1 %v1126_v8 }
  0x27   : > { %1046 = vmatprep.subr.bf16.mxu0 %v1127_v9  ;;  %1087 = vmatprep.subr.bf16.mxu1 %v1127_v9 }
  0x2a   : > { %1047 = vmatpush3.bf16.msra.mxu0 %v1127_v9  ;;  %1095 = vmatpush3.bf16.msra.mxu1 %v1127_v9 }
  0x2d   : > { %1049 = vmatmul.mubr.bf16.vlgmr.msra.gmra.mxu0 %v1129_v10  ;;  %1065 = vmatmul.mubr.bf16.vlgmr.msra.gmra.mxu1 %v1137_v11 }
  0x2e   : > { %1052 = vmatprep.mubr.bf16.mxu0 %v1130_v12  ;;  %1068 = vmatprep.mubr.bf16.mxu1 %v1138_v13 }
  0x35   : > { %1053 = vmatmul.mubr.bf16.gmra.mxu0 %v1131_v14  ;;  %1069 = vmatmul.mubr.bf16.gmra.mxu1 %v1139_v15 }
  0x36   : > { %1056 = vmatprep.mubr.bf16.mxu0 %v1132_v16  ;;  %1072 = vmatprep.mubr.bf16.mxu1 %v1140_v17 }
  0x3d   : > { %1057 = vmatmul.mubr.bf16.gmra.mxu0 %v1133_v18  ;;  %1073 = vmatmul.mubr.bf16.gmra.mxu1 %v1141_v19 }
  0x3e   : > { %1060 = vmatprep.mubr.bf16.mxu0 %v1134_v20  ;;  %1076 = vmatprep.mubr.bf16.mxu1 %v1142_v21 }
  0x45   : > { %1061 = vmatmul.mubr.bf16.gmra.mxu0 %v1135_v22  ;;  %1077 = vmatmul.mubr.bf16.gmra.mxu1 %v1143_v23 }
  0xed   : > { %v1050_v24 = vpop.f32.mrf.mxu0  ;;  %v1268_v25 = vpop.f32.mrf.mxu1 }
  0xee   : > { %650 = vst [vmem:[%s1266_s22 + $0x10] sm:$0xff] %v1050_v24  ;;  %666 = vst [vmem:[%s1266_s22 + $0x90] sm:$0xff] %v1268_v25  ;;  %v720_v37 = vmul.f32 %v1050_v24, %v1050_v24 }
  0xef   : > { %v521_v26 = vpop.f32.mrf.mxu0  ;;  %v1273_v27 = vpop.f32.mrf.mxu1 }
  0xf0   : > { %648 = vst [vmem:[%s1266_s22] sm:$0xff] %v521_v26  ;;  %664 = vst [vmem:[%s1266_s22 + $0x80] sm:$0xff] %v1273_v27  ;;  %v718_v32 = vmul.f32 %v521_v26, %v521_v26 }
  0xf1   : > { %v1051_v28 = vpop.f32.mrf.mxu0  ;;  %v1278_v29 = vpop.f32.mrf.mxu1 }
  0xf2   : > { %651 = vst [vmem:[%s1266_s22 + $0x18] sm:$0xff] %v1051_v28  ;;  %667 = vst [vmem:[%s1266_s22 + $0x98] sm:$0xff] %v1278_v29  ;;  %v721_v42 = vmul.f32 %v1051_v28, %v1051_v28 }
  0xf3   : > { %v524_v30 = vpop.f32.mrf.mxu0  ;;  %v1283_v31 = vpop.f32.mrf.mxu1 }
  0xf4   : > { %649 = vst [vmem:[%s1266_s22 + $0x8] sm:$0xff] %v524_v30  ;;  %v680_v33 = vadd.f32 %v524_v30, %v521_v26  ;;  %v719_v34 = vmul.f32 %v524_v30, %v524_v30  ;;  %665 = vst [vmem:[%s1266_s22 + $0x88] sm:$0xff] %v1283_v31 }
  0xf5   : > { %v1054_v35 = vpop.f32.mrf.mxu0  ;;  %v1288_v36 = vpop.f32.mrf.mxu1 }
  0xf6   : > { %v681_v38 = vadd.f32 %v1050_v24, %v680_v33  ;;  %v750_v39 = vadd.f32 %v719_v34, %v718_v32  ;;  %654 = vst [vmem:[%s1266_s22 + $0x30] sm:$0xff] %v1054_v35  ;;  %670 = vst [vmem:[%s1266_s22 + $0xb0] sm:$0xff] %v1288_v36  ;;  %v724_v57 = vmul.f32 %v1054_v35, %v1054_v35 }
  0xf7   : > { %v537_v40 = vpop.f32.mrf.mxu0  ;;  %v1293_v41 = vpop.f32.mrf.mxu1 }
  0xf8   : > { %v751_v43 = vadd.f32 %v750_v39, %v720_v37  ;;  %652 = vst [vmem:[%s1266_s22 + $0x20] sm:$0xff] %v537_v40  ;;  %v682_v44 = vadd.f32 %v1051_v28, %v681_v38  ;;  %668 = vst [vmem:[%s1266_s22 + $0xa0] sm:$0xff] %v1293_v41  ;;  %v722_v48 = vmul.f32 %v537_v40, %v537_v40 }
  0xf9   : > { %v1055_v45 = vpop.f32.mrf.mxu0  ;;  %v1298_v46 = vpop.f32.mrf.mxu1 }
  0xfa   : > { %v683_v47 = vadd.f32 %v682_v44, %v537_v40  ;;  %v752_v49 = vadd.f32 %v751_v43, %v721_v42  ;;  %655 = vst [vmem:[%s1266_s22 + $0x38] sm:$0xff] %v1055_v45  ;;  %671 = vst [vmem:[%s1266_s22 + $0xb8] sm:$0xff] %v1298_v46  ;;  %v725_v62 = vmul.f32 %v1055_v45, %v1055_v45 }
  0xfb   : > { %v540_v50 = vpop.f32.mrf.mxu0  ;;  %v1303_v51 = vpop.f32.mrf.mxu1  ;;  %v734_v43 = vmul.f32 %v1273_v27, %v1273_v27 }
  0xfc   : > { %v753_v52 = vadd.f32 %v752_v49, %v722_v48  ;;  %653 = vst [vmem:[%s1266_s22 + $0x28] sm:$0xff] %v540_v50  ;;  %v684_v53 = vadd.f32 %v683_v47, %v540_v50  ;;  %v723_v54 = vmul.f32 %v540_v50, %v540_v50  ;;  %669 = vst [vmem:[%s1266_s22 + $0xa8] sm:$0xff] %v1303_v51 }
  0xfd   : > { %v1058_v55 = vpop.f32.mrf.mxu0  ;;  %v1308_v56 = vpop.f32.mrf.mxu1  ;;  %v735_v48 = vmul.f32 %v1283_v31, %v1283_v31  ;;  %v736_v50 = vmul.f32 %v1268_v25, %v1268_v25 }
  0xfe   : > { %v685_v58 = vadd.f32 %v1054_v35, %v684_v53  ;;  %v754_v59 = vadd.f32 %v753_v52, %v723_v54  ;;  %658 = vst [vmem:[%s1266_s22 + $0x50] sm:$0xff] %v1058_v55  ;;  %674 = vst [vmem:[%s1266_s22 + $0xd0] sm:$0xff] %v1308_v56  ;;  %v728_v13 = vmul.f32 %v1058_v55, %v1058_v55 }
  0xff   : > { %v553_v60 = vpop.f32.mrf.mxu0  ;;  %v1313_v61 = vpop.f32.mrf.mxu1  ;;  %v737_v54 = vmul.f32 %v1278_v29, %v1278_v29 }
 0x100   : > { %v755_v63 = vadd.f32 %v754_v59, %v724_v57  ;;  %656 = vst [vmem:[%s1266_s22 + $0x40] sm:$0xff] %v553_v60  ;;  %v686_v0 = vadd.f32 %v1055_v45, %v685_v58  ;;  %672 = vst [vmem:[%s1266_s22 + $0xc0] sm:$0xff] %v1313_v61  ;;  %v726_v4 = vmul.f32 %v553_v60, %v553_v60 }
 0x101   : > { %v1059_v1 = vpop.f32.mrf.mxu0  ;;  %v1318_v2 = vpop.f32.mrf.mxu1  ;;  %v738_v58 = vmul.f32 %v1293_v41, %v1293_v41 }
 0x102   : > { %v687_v3 = vadd.f32 %v686_v0, %v553_v60  ;;  %v756_v5 = vadd.f32 %v755_v63, %v725_v62  ;;  %659 = vst [vmem:[%s1266_s22 + $0x58] sm:$0xff] %v1059_v1  ;;  %675 = vst [vmem:[%s1266_s22 + $0xd8] sm:$0xff] %v1318_v2  ;;  %v729_v18 = vmul.f32 %v1059_v1, %v1059_v1 }
 0x103   : > { %v556_v6 = vpop.f32.mrf.mxu0  ;;  %v1323_v7 = vpop.f32.mrf.mxu1  ;;  %v739_v62 = vmul.f32 %v1303_v51, %v1303_v51 }
 0x104   : > { %v757_v8 = vadd.f32 %v756_v5, %v726_v4  ;;  %657 = vst [vmem:[%s1266_s22 + $0x48] sm:$0xff] %v556_v6  ;;  %v688_v9 = vadd.f32 %v687_v3, %v556_v6  ;;  %v727_v10 = vmul.f32 %v556_v6, %v556_v6  ;;  %673 = vst [vmem:[%s1266_s22 + $0xc8] sm:$0xff] %v1323_v7 }
 0x105   : > { %v1062_v11 = vpop.f32.mrf.mxu0  ;;  %v1328_v12 = vpop.f32.mrf.mxu1  ;;  %v742_v4 = vmul.f32 %v1313_v61, %v1313_v61 }
 0x106   : > { %v689_v14 = vadd.f32 %v1058_v55, %v688_v9  ;;  %v758_v15 = vadd.f32 %v757_v8, %v727_v10  ;;  %662 = vst [vmem:[%s1266_s22 + $0x70] sm:$0xff] %v1062_v11  ;;  %678 = vst [vmem:[%s1266_s22 + $0xf0] sm:$0xff] %v1328_v12  ;;  %v732_v35 = vmul.f32 %v1062_v11, %v1062_v11 }
 0x107   : > { %v569_v16 = vpop.f32.mrf.mxu0  ;;  %v633_v17 = vpop.f32.mrf.mxu1  ;;  %v743_v8 = vmul.f32 %v1323_v7, %v1323_v7 }
 0x108   : > { %v759_v19 = vadd.f32 %v758_v15, %v728_v13  ;;  %660 = vst [vmem:[%s1266_s22 + $0x60] sm:$0xff] %v569_v16  ;;  %v690_v20 = vadd.f32 %v1059_v1, %v689_v14  ;;  %676 = vst [vmem:[%s1266_s22 + $0xe0] sm:$0xff] %v633_v17  ;;  %v730_v24 = vmul.f32 %v569_v16, %v569_v16 }
 0x109   : > { %v1063_v21 = vpop.f32.mrf.mxu0  ;;  %v1335_v22 = vpop.f32.mrf.mxu1  ;;  %v746_v14 = vmul.f32 %v633_v17, %v633_v17 }
 0x10a   : > { %v691_v23 = vadd.f32 %v690_v20, %v569_v16  ;;  %v760_v26 = vadd.f32 %v759_v19, %v729_v18  ;;  %663 = vst [vmem:[%s1266_s22 + $0x78] sm:$0xff] %v1063_v21  ;;  %679 = vst [vmem:[%s1266_s22 + $0xf8] sm:$0xff] %v1335_v22  ;;  %v733_v39 = vmul.f32 %v1063_v21, %v1063_v21 }
 0x10b   : > { %v572_v28 = vpop.f32.mrf.mxu0  ;;  %v636_v30 = vpop.f32.mrf.mxu1  ;;  %v748_v19 = vmul.f32 %v1328_v12, %v1328_v12 }
 0x10c   : > { %v761_v32 = vadd.f32 %v760_v26, %v730_v24  ;;  %661 = vst [vmem:[%s1266_s22 + $0x68] sm:$0xff] %v572_v28  ;;  %v692_v33 = vadd.f32 %v691_v23, %v572_v28  ;;  %v731_v34 = vmul.f32 %v572_v28, %v572_v28  ;;  %677 = vst [vmem:[%s1266_s22 + $0xe8] sm:$0xff] %v636_v30 }
 0x10e   : > { %v693_v37 = vadd.f32 %v1062_v11, %v692_v33  ;;  %v762_v38 = vadd.f32 %v761_v32, %v731_v34 }
 0x110   : > { %v694_v40 = vadd.f32 %v1063_v21, %v693_v37  ;;  %v763_v42 = vadd.f32 %v762_v38, %v732_v35  ;;  %v749_v21 = vmul.f32 %v1335_v22, %v1335_v22 }
 0x112   : > { %v764_v44 = vadd.f32 %v763_v42, %v733_v39  ;;  %v695_v45 = vadd.f32 %v694_v40, %v1273_v27 }
 0x114   : > { %v696_v47 = vadd.f32 %v695_v45, %v1283_v31  ;;  %v765_v49 = vadd.f32 %v764_v44, %v734_v43 }
 0x116   : > { %v697_v52 = vadd.f32 %v1268_v25, %v696_v47  ;;  %v766_v53 = vadd.f32 %v765_v49, %v735_v48  ;;  %v740_v25 = vmul.f32 %v1288_v36, %v1288_v36 }
 0x118   : > { %v767_v55 = vadd.f32 %v766_v53, %v736_v50  ;;  %v698_v57 = vadd.f32 %v1278_v29, %v697_v52  ;;  %v741_v29 = vmul.f32 %v1298_v46, %v1298_v46 }
 0x11a   : > { %v699_v27 = vadd.f32 %v698_v57, %v1293_v41  ;;  %v768_v59 = vadd.f32 %v767_v55, %v737_v54 }
 0x11c   : > { %v769_v31 = vadd.f32 %v768_v59, %v738_v58  ;;  %v700_v60 = vadd.f32 %v699_v27, %v1303_v51 }
 0x11e   : > { %v701_v63 = vadd.f32 %v1288_v36, %v700_v60  ;;  %v770_v0 = vadd.f32 %v769_v31, %v739_v62  ;;  %v744_v36 = vmul.f32 %v1308_v56, %v1308_v56 }
 0x120   : > { %v771_v1 = vadd.f32 %v770_v0, %v740_v25  ;;  %v702_v3 = vadd.f32 %v1298_v46, %v701_v63  ;;  %v745_v46 = vmul.f32 %v1318_v2, %v1318_v2 }
 0x122   : > { %v703_v41 = vadd.f32 %v702_v3, %v1313_v61  ;;  %v772_v5 = vadd.f32 %v771_v1, %v741_v29 }
 0x124   : > { %v773_v6 = vadd.f32 %v772_v5, %v742_v4  ;;  %v704_v51 = vadd.f32 %v703_v41, %v1323_v7  ;;  %v747_v7 = vmul.f32 %v636_v30, %v636_v30 }
 0x126   : > { %v705_v9 = vadd.f32 %v1308_v56, %v704_v51  ;;  %v774_v10 = vadd.f32 %v773_v6, %v743_v8 }
 0x128   : > { %v775_v11 = vadd.f32 %v774_v10, %v744_v36  ;;  %v706_v61 = vadd.f32 %v1318_v2, %v705_v9 }
 0x12a   : > { %v707_v13 = vadd.f32 %v706_v61, %v633_v17  ;;  %v776_v15 = vadd.f32 %v775_v11, %v745_v46 }
 0x12c   : > { %v777_v16 = vadd.f32 %v776_v15, %v746_v14  ;;  %v708_v18 = vadd.f32 %v707_v13, %v636_v30 }
 0x12e   : > { %v709_v56 = vadd.f32 %v1328_v12, %v708_v18  ;;  %v778_v20 = vadd.f32 %v777_v16, %v747_v7 }
 0x130   : > { %v710_v23 = vadd.f32 %v1335_v22, %v709_v56  ;;  %v779_v24 = vadd.f32 %v778_v20, %v748_v19 }
 0x132   : > { %v711_v2 = vrot.slane %v710_v23, 4  ;;  %v780_v26 = vadd.f32 %v779_v24, %v749_v21 }
 0x134   : > { %v712_v17 = vadd.f32 %v711_v2, %v710_v23  ;;  %v781_v28 = vrot.slane %v780_v26, 4 }
 0x136   : > { %v713_v32 = vrot.slane %v712_v17, 2  ;;  %v782_v33 = vadd.f32 %v781_v28, %v780_v26 }
 0x138   : > { %v714_v30 = vadd.f32 %v713_v32, %v712_v17  ;;  %v783_v34 = vrot.slane %v782_v33, 2 }
 0x13a   : > { %v715_v35 = vrot.slane %v714_v30, 1  ;;  %v784_v37 = vadd.f32 %v783_v34, %v782_v33 }
 0x13c   : > { %v716_v12 = vadd.f32 %v715_v35, %v714_v30  ;;  %v785_v38 = vrot.slane %v784_v37, 1 }
 0x13e   : > { %717 = vst [vmem:[%s286_s24] sm:$0x1] %v716_v12  ;;  %v786_v22 = vadd.f32 %v785_v38, %v784_v37 }
 0x140   : > { %787 = vst [vmem:[%s293_s27] sm:$0x1] %v786_v22 }
 0x141 PF: > { %s15_s17 = sadd.s32 1, %s1166_s17   ;;  %s1406_s15 = smov %s1162_s16 }
 0x142   : > { %p12_p6 = scmp.ge.s32.totalorder %s15_s17, 4   ;;  %s1407_s16 = smov %s1409_s18 }
 0x144   :  { %14 = sbr.rel (!%p12_p6) target bundleno = 2 (0x2), region = 85 }

// kernel: netG_forward.21
= control target key start
LH: loop header
LB: loop body
LE: loop exit
PB: predicated region body
PF: predicated region fallthrough
CT: control target
= control target key end

     0   :  { %s1034_s9 = smov 0   ;;  %s1036_s10 = smov 0   ;;  %s1154_s0 = inlined_call_operand.vmem [shape: bf16[4,512,128], index: 0, kind: input, shape index: {}]   ;;  %s1155_s1 = inlined_call_operand.vmem [shape: bf16[4,128,128], index: 1, kind: input, shape index: {}]   ;;  %s1156_s2 = inlined_call_operand.vmem [shape: f32[4,512,128], index: 2, kind: output, shape index: {}]  }
   0x1   :  { %s1038_s11 = smov 0   ;;  %s1040_s12 = smov 0  }
   0x2   :  { %s1042_s13 = smov 0  }
   0x3 LB: > { %s21_s14 = sadd.s32 1, %s1009_s11  ;;  %s24_s15 = sadd.s32 1, %s1013_s12  ;;  %s1017_s13 = sphi %s1042_s13, %s12_s13   ;;  %s1013_s12 = sphi %s1040_s12, %s1160_s12   ;;  %s1009_s11 = sphi %s1038_s11, %s1159_s11   ;;  %s1005_s10 = sphi %s1036_s10, %s1158_s10   ;;  %s1001_s9 = sphi %s1034_s9, %s1157_s9  }
   0x4   : > { %p22_p0 = scmp.ge.s32.totalorder %s21_s14, 2  ;;  %p727_p1 = scmp.ge.s32.totalorder %s1017_s13, 1 }
   0x5   : > { %p143_p2 = scmp.lt.s32.totalorder %s1017_s13, 9 }
   0x6   : > { %s1162_s14 = smov (%p22_p0, %s21_s14), 0  ;;  %s1164_s15 = smov (!%p22_p0, %s24_s15), %s1013_s12 }
   0x7   : > { %p144_p3 = pnand %p727_p1, %p143_p2  ;;  %p26_p4 = scmp.ge.s32.totalorder %s1164_s15, 4 }
   0x8   : > { %s728_s16 = sshll.u32 (!%p144_p3), %s1001_s9, 5  ;;  %p179_p5 = scmp.lt.s32.totalorder (!%p144_p3), %s1005_s10, 3 }
   0x9   : > { %s1166_s15 = smov (%p26_p4, %s1164_s15), 0  ;;  %147 = sbr.rel (%p144_p3) target bundleno = 289 (0x121), region = 28 }
   0xa   : > { %p181_p6 = scmp.lt.s32.totalorder (!%p144_p3), %s728_s16, 63 }
   0xe   : > { %s1168_s10 = smov (!%p179_p5, %s1005_s10), 3  ;;  %s1170_s16 = smov (!%p181_p6, %s728_s16), 63 }
   0xf   : > { %s729_s17 = sshll.u32 %s1168_s10, 6 }
  0x10   : > { %s1067_s20 = scalar_lea.vmem %s1155_s1, %s729_s17  ;;  %s1069_s21 = sadd.s32 %s729_s17, %s1170_s16 }
  0x11   : > { %v891_v0 = vld [vmem:[%s1067_s20 + $0x38] sm:$0xff]   ;;  %v892_v1 = vld [vmem:[%s1067_s20 + $0x30] sm:$0xff]   ;;  %s730_s22 = sshll.u32 %s1069_s21, 2  ;;  %v893_v2 = vld [vmem:[%s1067_s20 + $0x28] sm:$0xff]   ;;  %s735_s26 = sshll.u32 %s1069_s21, 3 }
  0x12   : > { %787 = vmatprep.subr.bf16.mxu0 %v891_v0  ;;  %835 = vmatprep.subr.bf16.mxu1 %v891_v0  ;;  %s1078_s25 = scalar_lea.vmem %s1154_s0, %s730_s22  ;;  %v894_v3 = vld [vmem:[%s1067_s20 + $0x20] sm:$0xff]   ;;  %v895_v6 = vld [vmem:[%s1067_s20 + $0x18] sm:$0xff]   ;;  %v896_v7 = vld [vmem:[%s1067_s20 + $0x10] sm:$0xff]   ;;  %s1105_s29 = scalar_lea.vmem %s1156_s2, %s735_s26 }
  0x13   : > { %788 = vmatpush3.bf16.msra.mxu0 %v891_v0  ;;  %843 = vmatpush3.bf16.msra.mxu1 %v891_v0  ;;  %v899_v4 = vld [vmem:[%s1078_s25] sm:$0xff]   ;;  %v897_v8 = vld [vmem:[%s1067_s20 + $0x8] sm:$0xff]   ;;  %v903_v12 = vld [vmem:[%s1078_s25 + $0x10] sm:$0xff]  }
  0x14   : > { %789 = vmatprep.subr.bf16.mxu0 %v892_v1  ;;  %836 = vmatprep.subr.bf16.mxu1 %v892_v1  ;;  %v900_v5 = vld [vmem:[%s1078_s25 + $0x40] sm:$0xff]   ;;  %v901_v10 = vld [vmem:[%s1078_s25 + $0x8] sm:$0xff]   ;;  %v904_v13 = vld [vmem:[%s1078_s25 + $0x50] sm:$0xff]  }
  0x15   : > { %803 = vmatprep.mubr.bf16.mxu0 %v899_v4  ;;  %819 = vmatprep.mubr.bf16.mxu1 %v900_v5  ;;  %v898_v9 = vld [vmem:[%s1067_s20] sm:$0xff]   ;;  %v902_v11 = vld [vmem:[%s1078_s25 + $0x48] sm:$0xff]   ;;  %v905_v14 = vld [vmem:[%s1078_s25 + $0x18] sm:$0xff]  }
  0x16   : > { %v906_v15 = vld [vmem:[%s1078_s25 + $0x58] sm:$0xff]   ;;  %v907_v16 = vld [vmem:[%s1078_s25 + $0x20] sm:$0xff]   ;;  %v909_v18 = vld [vmem:[%s1078_s25 + $0x28] sm:$0xff]  }
  0x17   : > { %790 = vmatpush3.bf16.msra.mxu0 %v892_v1  ;;  %844 = vmatpush3.bf16.msra.mxu1 %v892_v1  ;;  %v908_v17 = vld [vmem:[%s1078_s25 + $0x60] sm:$0xff]   ;;  %v910_v19 = vld [vmem:[%s1078_s25 + $0x68] sm:$0xff]   ;;  %v911_v20 = vld [vmem:[%s1078_s25 + $0x30] sm:$0xff]  }
  0x18   : > { %791 = vmatprep.subr.bf16.mxu0 %v893_v2  ;;  %837 = vmatprep.subr.bf16.mxu1 %v893_v2  ;;  %v912_v21 = vld [vmem:[%s1078_s25 + $0x70] sm:$0xff]   ;;  %v913_v22 = vld [vmem:[%s1078_s25 + $0x38] sm:$0xff]  }
  0x19   : > { %v914_v23 = vld [vmem:[%s1078_s25 + $0x78] sm:$0xff]  }
  0x1b   : > { %792 = vmatpush3.bf16.msra.mxu0 %v893_v2  ;;  %845 = vmatpush3.bf16.msra.mxu1 %v893_v2 }
  0x1c   : > { %793 = vmatprep.subr.bf16.mxu0 %v894_v3  ;;  %838 = vmatprep.subr.bf16.mxu1 %v894_v3 }
  0x1f   : > { %794 = vmatpush3.bf16.msra.mxu0 %v894_v3  ;;  %846 = vmatpush3.bf16.msra.mxu1 %v894_v3 }
  0x20   : > { %795 = vmatprep.subr.bf16.mxu0 %v895_v6  ;;  %839 = vmatprep.subr.bf16.mxu1 %v895_v6 }
  0x23   : > { %796 = vmatpush3.bf16.msra.mxu0 %v895_v6  ;;  %847 = vmatpush3.bf16.msra.mxu1 %v895_v6 }
  0x24   : > { %797 = vmatprep.subr.bf16.mxu0 %v896_v7  ;;  %840 = vmatprep.subr.bf16.mxu1 %v896_v7 }
  0x27   : > { %798 = vmatpush3.bf16.msra.mxu0 %v896_v7  ;;  %848 = vmatpush3.bf16.msra.mxu1 %v896_v7 }
  0x28   : > { %799 = vmatprep.subr.bf16.mxu0 %v897_v8  ;;  %841 = vmatprep.subr.bf16.mxu1 %v897_v8 }
  0x2b   : > { %800 = vmatpush3.bf16.msra.mxu0 %v897_v8  ;;  %849 = vmatpush3.bf16.msra.mxu1 %v897_v8 }
  0x2c   : > { %801 = vmatprep.subr.bf16.mxu0 %v898_v9  ;;  %842 = vmatprep.subr.bf16.mxu1 %v898_v9 }
  0x2f   : > { %802 = vmatpush3.bf16.msra.mxu0 %v898_v9  ;;  %850 = vmatpush3.bf16.msra.mxu1 %v898_v9 }
  0x32   : > { %804 = vmatmul.mubr.bf16.vlgmr.msra.gmra.mxu0 %v901_v10  ;;  %820 = vmatmul.mubr.bf16.vlgmr.msra.gmra.mxu1 %v902_v11 }
  0x33   : > { %807 = vmatprep.mubr.bf16.mxu0 %v903_v12  ;;  %823 = vmatprep.mubr.bf16.mxu1 %v904_v13 }
  0x3a   : > { %808 = vmatmul.mubr.bf16.gmra.mxu0 %v905_v14  ;;  %824 = vmatmul.mubr.bf16.gmra.mxu1 %v906_v15 }
  0x3b   : > { %811 = vmatprep.mubr.bf16.mxu0 %v907_v16  ;;  %827 = vmatprep.mubr.bf16.mxu1 %v908_v17 }
  0x42   : > { %812 = vmatmul.mubr.bf16.gmra.mxu0 %v909_v18  ;;  %828 = vmatmul.mubr.bf16.gmra.mxu1 %v910_v19 }
  0x43   : > { %815 = vmatprep.mubr.bf16.mxu0 %v911_v20  ;;  %831 = vmatprep.mubr.bf16.mxu1 %v912_v21 }
  0x4a   : > { %816 = vmatmul.mubr.bf16.gmra.mxu0 %v913_v22  ;;  %832 = vmatmul.mubr.bf16.gmra.mxu1 %v914_v23 }
  0xf2   : > { %v805_v24 = vpop.f32.mrf.mxu0  ;;  %v821_v25 = vpop.f32.mrf.mxu1 }
  0xf3   : > { %915 = vtanh.f32 %v805_v24 }
  0xf4   : > { %917 = vtanh.f32 %v821_v25  ;;  %v430_v26 = vpop.f32.mrf.mxu0  ;;  %v494_v27 = vpop.f32.mrf.mxu1 }
  0xf5   : > { %919 = vtanh.f32 %v430_v26 }
  0xf6   : > { %921 = vtanh.f32 %v494_v27  ;;  %v806_v28 = vpop.f32.mrf.mxu0  ;;  %v822_v29 = vpop.f32.mrf.mxu1 }
  0xf7   : > { %923 = vtanh.f32 %v806_v28 }
  0xf8   : > { %925 = vtanh.f32 %v822_v29  ;;  %v433_v30 = vpop.f32.mrf.mxu0  ;;  %v497_v31 = vpop.f32.mrf.mxu1 }
  0xf9   : > { %927 = vtanh.f32 %v433_v30 }
  0xfa   : > { %929 = vtanh.f32 %v497_v31  ;;  %v809_v32 = vpop.f32.mrf.mxu0  ;;  %v825_v33 = vpop.f32.mrf.mxu1 }
  0xfb   : > { %931 = vtanh.f32 %v809_v32 }
  0xfc   : > { %933 = vtanh.f32 %v825_v33  ;;  %v446_v34 = vpop.f32.mrf.mxu0  ;;  %v510_v35 = vpop.f32.mrf.mxu1 }
  0xfd   : > { %935 = vtanh.f32 %v446_v34 }
  0xfe   : > { %937 = vtanh.f32 %v510_v35  ;;  %v810_v36 = vpop.f32.mrf.mxu0  ;;  %v826_v37 = vpop.f32.mrf.mxu1 }
  0xff   : > { %939 = vtanh.f32 %v810_v36 }
 0x100   : > { %v916_v38 = vpop.eup %915  ;;  %941 = vtanh.f32 %v826_v37  ;;  %v449_v39 = vpop.f32.mrf.mxu0 }
 0x101   : > { %v513_v40 = vpop.f32.mrf.mxu1  ;;  %v918_v41 = vpop.eup %917  ;;  %591 = vst [vmem:[%s1105_s29 + $0x10] sm:$0xff] %v916_v38  ;;  %943 = vtanh.f32 %v449_v39 }
 0x102   : > { %v920_v42 = vpop.eup %919  ;;  %607 = vst [vmem:[%s1105_s29 + $0x90] sm:$0xff] %v918_v41  ;;  %945 = vtanh.f32 %v513_v40  ;;  %v813_v43 = vpop.f32.mrf.mxu0 }
 0x103   : > { %v829_v44 = vpop.f32.mrf.mxu1  ;;  %v922_v45 = vpop.eup %921  ;;  %589 = vst [vmem:[%s1105_s29] sm:$0xff] %v920_v42  ;;  %947 = vtanh.f32 %v813_v43 }
 0x104   : > { %v924_v46 = vpop.eup %923  ;;  %605 = vst [vmem:[%s1105_s29 + $0x80] sm:$0xff] %v922_v45  ;;  %949 = vtanh.f32 %v829_v44  ;;  %v462_v47 = vpop.f32.mrf.mxu0 }
 0x105   : > { %v526_v48 = vpop.f32.mrf.mxu1  ;;  %v926_v49 = vpop.eup %925  ;;  %592 = vst [vmem:[%s1105_s29 + $0x18] sm:$0xff] %v924_v46  ;;  %951 = vtanh.f32 %v462_v47 }
 0x106   : > { %v928_v50 = vpop.eup %927  ;;  %608 = vst [vmem:[%s1105_s29 + $0x98] sm:$0xff] %v926_v49  ;;  %953 = vtanh.f32 %v526_v48  ;;  %v814_v51 = vpop.f32.mrf.mxu0 }
 0x107   : > { %v830_v52 = vpop.f32.mrf.mxu1  ;;  %v930_v53 = vpop.eup %929  ;;  %590 = vst [vmem:[%s1105_s29 + $0x8] sm:$0xff] %v928_v50  ;;  %955 = vtanh.f32 %v814_v51 }
 0x108   : > { %v932_v54 = vpop.eup %931  ;;  %606 = vst [vmem:[%s1105_s29 + $0x88] sm:$0xff] %v930_v53  ;;  %957 = vtanh.f32 %v830_v52  ;;  %v465_v55 = vpop.f32.mrf.mxu0 }
 0x109   : > { %v529_v56 = vpop.f32.mrf.mxu1  ;;  %v934_v57 = vpop.eup %933  ;;  %595 = vst [vmem:[%s1105_s29 + $0x30] sm:$0xff] %v932_v54  ;;  %959 = vtanh.f32 %v465_v55 }
 0x10a   : > { %v936_v58 = vpop.eup %935  ;;  %611 = vst [vmem:[%s1105_s29 + $0xb0] sm:$0xff] %v934_v57  ;;  %961 = vtanh.f32 %v529_v56  ;;  %v817_v59 = vpop.f32.mrf.mxu0 }
 0x10b   : > { %v833_v60 = vpop.f32.mrf.mxu1  ;;  %v938_v61 = vpop.eup %937  ;;  %593 = vst [vmem:[%s1105_s29 + $0x20] sm:$0xff] %v936_v58  ;;  %963 = vtanh.f32 %v817_v59 }
 0x10c   : > { %v940_v62 = vpop.eup %939  ;;  %609 = vst [vmem:[%s1105_s29 + $0xa0] sm:$0xff] %v938_v61  ;;  %965 = vtanh.f32 %v833_v60  ;;  %v478_v63 = vpop.f32.mrf.mxu0 }
 0x10d   : > { %v542_v0 = vpop.f32.mrf.mxu1  ;;  %v942_v1 = vpop.eup %941  ;;  %596 = vst [vmem:[%s1105_s29 + $0x38] sm:$0xff] %v940_v62  ;;  %967 = vtanh.f32 %v478_v63 }
 0x10e   : > { %v944_v2 = vpop.eup %943  ;;  %612 = vst [vmem:[%s1105_s29 + $0xb8] sm:$0xff] %v942_v1  ;;  %969 = vtanh.f32 %v542_v0  ;;  %v818_v3 = vpop.f32.mrf.mxu0 }
 0x10f   : > { %v834_v4 = vpop.f32.mrf.mxu1  ;;  %v946_v5 = vpop.eup %945  ;;  %594 = vst [vmem:[%s1105_s29 + $0x28] sm:$0xff] %v944_v2  ;;  %971 = vtanh.f32 %v818_v3 }
 0x110   : > { %v948_v6 = vpop.eup %947  ;;  %610 = vst [vmem:[%s1105_s29 + $0xa8] sm:$0xff] %v946_v5  ;;  %973 = vtanh.f32 %v834_v4  ;;  %v481_v7 = vpop.f32.mrf.mxu0 }
 0x111   : > { %v545_v8 = vpop.f32.mrf.mxu1  ;;  %v950_v9 = vpop.eup %949  ;;  %599 = vst [vmem:[%s1105_s29 + $0x50] sm:$0xff] %v948_v6  ;;  %975 = vtanh.f32 %v481_v7 }
 0x112   : > { %v952_v10 = vpop.eup %951  ;;  %615 = vst [vmem:[%s1105_s29 + $0xd0] sm:$0xff] %v950_v9  ;;  %977 = vtanh.f32 %v545_v8 }
 0x113   : > { %v954_v11 = vpop.eup %953  ;;  %597 = vst [vmem:[%s1105_s29 + $0x40] sm:$0xff] %v952_v10 }
 0x114   : > { %v956_v12 = vpop.eup %955  ;;  %613 = vst [vmem:[%s1105_s29 + $0xc0] sm:$0xff] %v954_v11 }
 0x115   : > { %v958_v13 = vpop.eup %957  ;;  %600 = vst [vmem:[%s1105_s29 + $0x58] sm:$0xff] %v956_v12 }
 0x116   : > { %v960_v14 = vpop.eup %959  ;;  %616 = vst [vmem:[%s1105_s29 + $0xd8] sm:$0xff] %v958_v13 }
 0x117   : > { %v962_v15 = vpop.eup %961  ;;  %598 = vst [vmem:[%s1105_s29 + $0x48] sm:$0xff] %v960_v14 }
 0x118   : > { %v964_v16 = vpop.eup %963  ;;  %614 = vst [vmem:[%s1105_s29 + $0xc8] sm:$0xff] %v962_v15 }
 0x119   : > { %v966_v17 = vpop.eup %965  ;;  %603 = vst [vmem:[%s1105_s29 + $0x70] sm:$0xff] %v964_v16 }
 0x11a   : > { %v968_v18 = vpop.eup %967  ;;  %619 = vst [vmem:[%s1105_s29 + $0xf0] sm:$0xff] %v966_v17 }
 0x11b   : > { %v970_v19 = vpop.eup %969  ;;  %601 = vst [vmem:[%s1105_s29 + $0x60] sm:$0xff] %v968_v18 }
 0x11c   : > { %v972_v20 = vpop.eup %971  ;;  %617 = vst [vmem:[%s1105_s29 + $0xe0] sm:$0xff] %v970_v19 }
 0x11d   : > { %v974_v21 = vpop.eup %973  ;;  %604 = vst [vmem:[%s1105_s29 + $0x78] sm:$0xff] %v972_v20 }
 0x11e   : > { %v976_v22 = vpop.eup %975  ;;  %620 = vst [vmem:[%s1105_s29 + $0xf8] sm:$0xff] %v974_v21 }
 0x11f   : > { %v978_v23 = vpop.eup %977  ;;  %602 = vst [vmem:[%s1105_s29 + $0x68] sm:$0xff] %v976_v22 }
 0x120   : > { %618 = vst [vmem:[%s1105_s29 + $0xe8] sm:$0xff] %v978_v23 }
 0x121 PF: > { %s12_s13 = sadd.s32 1, %s1017_s13   ;;  %s1157_s9 = smov %s1009_s11 }
 0x122   : > { %p9_p7 = scmp.ge.s32.totalorder %s12_s13, 10   ;;  %s1158_s10 = smov %s1013_s12 }
 0x123   : > { %s1159_s11 = smov %s1162_s14  ;;  %s1160_s12 = smov %s1166_s15 }
 0x124   :  { %11 = sbr.rel (!%p9_p7) target bundleno = 3 (0x3), region = 61 }

</bundles_post_ra>
